<compile_context>
chip_gen: v7x
topology: tpu7x:2x2x1
jax: 0.10.0
libtpu: 0.0.40
codegen_flags: <defaults>
</compile_context>

<pallas_src>
import functools

import jax
import jax.numpy as jnp
from jax import lax
from jax.experimental import pallas as pl
from jax.experimental.pallas import tpu as pltpu


def _l2_normalize(x):
    # F.normalize(x, p=2, dim=-1, eps=1e-12) == x / max(||x||, 1e-12)
    ss = jnp.sum(x * x, axis=-1, keepdims=True)
    return x * lax.rsqrt(jnp.maximum(ss, 1e-24))


def _vmem_limit_bytes():
    # Per-generation scoped-VMEM limit: ~3/4 of physical, capped at 96 MiB.
    try:
        cap = pltpu.get_tpu_info().vmem_capacity_bytes
    except Exception:
        cap = 64 * 1024 * 1024  # conservative (v7x physical VMEM per TC)
    return int(min(cap * 3 // 4, 96 * 1024 * 1024))


def _bclassifier_kernel(n_valid, dim, mask_needed,
                        feats_ref, wqv_ref, bqv_ref, qmax_ref,
                        s_ref, m_out_ref, l_out_ref, b_out_ref,
                        m_scr, l_scr, b_scr):
    p = pl.program_id(0)                      # split index ("parallel")
    t = pl.program_id(1)                      # tile index within split ("arbitrary")
    n_tiles = pl.num_programs(1)
    tile_n = feats_ref.shape[0]

    @pl.when(t == 0)
    def _init():
        m_scr[...] = jnp.full(m_scr.shape, -jnp.inf, jnp.float32)
        l_scr[...] = jnp.zeros(l_scr.shape, jnp.float32)
        b_scr[...] = jnp.zeros(b_scr.shape, jnp.float32)

    feats = feats_ref[...]                    # (TN, D_in) compute dtype

    # Fused [Q | V] projection: one >=256-lane MXU matmul, f32 accumulation.
    qv = jnp.dot(feats, wqv_ref[...],
                 preferred_element_type=jnp.float32) + bqv_ref[...]
    qn = _l2_normalize(qv[:, :dim])                           # (TN, dim)
    vn = _l2_normalize(jnp.maximum(qv[:, dim:], 0.0))         # (TN, D_in)

    # Attention logits, lane-dense: S[c, n] = <q_max_scaled[c], Qn[n]>
    s = lax.dot_general(qmax_ref[...], qn, (((1,), (1,)), ((), ())),
                        preferred_element_type=jnp.float32)   # (C, TN)
    s_ref[...] = s                                            # raw logits tile

    def _accumulate(s_acc):
        m_old = m_scr[...]
        m_new = jnp.maximum(m_old, jnp.max(s_acc, axis=-1, keepdims=True))
        alpha = jnp.exp(m_old - m_new)
        pexp = jnp.exp(s_acc - m_new)                         # (C, TN)
        l_scr[...] = alpha * l_scr[...] + jnp.sum(pexp, axis=-1, keepdims=True)
        b_scr[...] = alpha * b_scr[...] + jnp.dot(
            pexp, vn, preferred_element_type=jnp.float32)
        m_scr[...] = m_new

    if mask_needed:
        # Only tiles straddling / beyond n_valid pay the mask (pl.when-gated).
        col0 = (p * n_tiles + t) * tile_n

        @pl.when(col0 + tile_n <= n_valid)
        def _acc_full():
            _accumulate(s)

        @pl.when(col0 + tile_n > n_valid)
        def _acc_masked():
            col = lax.broadcasted_iota(jnp.int32, s.shape, 1)
            # -1e30 (finite) so fully-padded splits stay finite and merge to 0.
            _accumulate(jnp.where(col0 + col < n_valid, s, -1e30))
    else:
        _accumulate(s)

    @pl.when(t == n_tiles - 1)
    def _finalize():
        m_out_ref[0] = m_scr[...]
        l_out_ref[0] = l_scr[...]
        b_out_ref[0] = b_scr[...]


@functools.partial(jax.jit, static_argnames=("tile_n", "n_split", "compute_dtype",
                                             "single_buffer_weights"))
def _bclassifier_forward_impl(feats, c, params, *, tile_n, n_split, compute_dtype,
                              single_buffer_weights):
    n, d_in = feats.shape
    n_cls = c.shape[1]
    dim = params["wq"].shape[0]
    assert tile_n % 128 == 0
    assert d_in % 128 == 0 and dim % 128 == 0

    # ---- wrapper-side prep (tiny) ----
    # Fused [Wq^T | Wv^T] so the per-tile projection is one wide matmul.
    wqv_t = jnp.concatenate([params["wq"].T, params["wv"].T],
                            axis=1).astype(compute_dtype)       # (D_in, dim+D_in)
    bqv = jnp.concatenate([params["bq"], params["bv"]]).reshape(
        1, dim + d_in).astype(jnp.float32)

    # Per-class top-1 instance (max_k=1) and its scaled q projection.
    # TODO(synk): torch.sort(descending) tie-breaking may differ from argmax on exact ties.
    top_idx = jnp.argmax(c, axis=0)                             # (C,)
    m_feats = feats[top_idx]                                    # (C, D_in) f32
    q_max = m_feats @ params["wq"].T + params["bq"]             # (C, dim) f32
    q_max_scaled = q_max * (1.0 / jnp.sqrt(jnp.float32(dim)))

    # Grid layout: (n_split "parallel", tiles_per_split "arbitrary").
    n_tiles_total = -(-n // tile_n)
    if n_split is None:
        n_split = 2 if n_tiles_total >= 2 else 1
    tiles_per_split = -(-n_tiles_total // n_split)
    n_pad = n_split * tiles_per_split * tile_n

    feats_k = feats.astype(compute_dtype)                       # cast before pad
    if n_pad != n:
        feats_k = jnp.pad(feats_k, ((0, n_pad - n), (0, 0)))

    def _const_spec(shape):
        zeros = (0,) * len(shape)
        if single_buffer_weights:
            return pl.BlockSpec(shape, lambda p, t: zeros,
                                pipeline_mode=pl.Buffered(1))
        return pl.BlockSpec(shape, lambda p, t: zeros)

    grid_spec = pltpu.PrefetchScalarGridSpec(
        num_scalar_prefetch=0,
        grid=(n_split, tiles_per_split),
        in_specs=[
            pl.BlockSpec((tile_n, d_in),
                         lambda p, t: (p * tiles_per_split + t, 0)),  # feats tiles
            _const_spec((d_in, dim + d_in)),                          # [Wq^T|Wv^T]
            _const_spec((1, dim + d_in)),                             # [bq|bv]
            _const_spec((n_cls, dim)),                                # q_max (scaled)
        ],
        out_specs=(
            pl.BlockSpec((n_cls, tile_n),
                         lambda p, t: (0, p * tiles_per_split + t)),  # raw logits
            pl.BlockSpec((1, n_cls, 1), lambda p, t: (p, 0, 0)),      # partial m
            pl.BlockSpec((1, n_cls, 1), lambda p, t: (p, 0, 0)),      # partial l
            pl.BlockSpec((1, n_cls, d_in), lambda p, t: (p, 0, 0)),   # partial B acc
        ),
        scratch_shapes=[
            pltpu.VMEM((n_cls, 1), jnp.float32),                      # running max
            pltpu.VMEM((n_cls, 1), jnp.float32),                      # running denom
            pltpu.VMEM((n_cls, d_in), jnp.float32),                   # running A^T@Vn
        ],
    )

    kernel = functools.partial(_bclassifier_kernel, n, dim, n_pad != n)

    s_logits, m_p, l_p, b_p = pl.pallas_call(
        kernel,
        grid_spec=grid_spec,
        out_shape=(
            jax.ShapeDtypeStruct((n_cls, n_pad), jnp.float32),
            jax.ShapeDtypeStruct((n_split, n_cls, 1), jnp.float32),
            jax.ShapeDtypeStruct((n_split, n_cls, 1), jnp.float32),
            jax.ShapeDtypeStruct((n_split, n_cls, d_in), jnp.float32),
        ),
        compiler_params=pltpu.CompilerParams(
            dimension_semantics=("parallel", "arbitrary"),
            vmem_limit_bytes=_vmem_limit_bytes(),
        ),
    )(feats_k, wqv_t, bqv, q_max_scaled)

    # ---- tiny wrapper-side finalize (O(C*D_in)) ----
    # Merge per-split online-softmax partials.
    m_g = jnp.max(m_p, axis=0)                                  # (C, 1)
    scale = jnp.exp(m_p - m_g)                                  # (P, C, 1)
    l_g = jnp.sum(scale * l_p, axis=0)                          # (C, 1)
    lse = m_g + jnp.log(l_g)                                    # (C, 1)
    bagg = jnp.sum(scale * b_p, axis=0) / l_g                   # (C, D_in) == A^T @ Vn

    a = jnp.exp(s_logits[:, :n] - lse).T                        # (N, C) softmax over N
    bp = bagg @ params["wproj"].T + params["bproj"]             # (C, D_in)
    c_out = (jnp.einsum("oik,ik->o", params["wfcc"], bp)
             + params["bfcc"]).reshape(1, n_cls)                # Conv1d(C,C,k=D_in)
    return c_out, a, bp.reshape(1, n_cls, d_in)


def bclassifier_forward(feats, c, params, *, tile_n=512, n_split=None,
                        compute_dtype=jnp.bfloat16):
    """Pallas TPU forward of BClassifier.  Returns (C, A, B) like the torch module."""
    try:
        return _bclassifier_forward_impl(
            feats, c, params, tile_n=tile_n, n_split=n_split,
            compute_dtype=compute_dtype, single_buffer_weights=True)
    except Exception:
        # Fallback if pl.Buffered(1) single-buffering is unsupported on this build.
        return _bclassifier_forward_impl(
            feats, c, params, tile_n=tile_n, n_split=n_split,
            compute_dtype=compute_dtype, single_buffer_weights=False)


def make_params(key, input_size, output_class, dim):
    """Parameters in native PyTorch layouts (Linear: (out, in); Conv1d: (out, in, k))."""
    ks = jax.random.split(key, 8)
    s = 0.1
    return {
        "wq": s * jax.random.normal(ks[0], (dim, input_size), jnp.float32),
        "bq": s * jax.random.normal(ks[1], (dim,), jnp.float32),
        "wv": s * jax.random.normal(ks[2], (input_size, input_size), jnp.float32),
        "bv": s * jax.random.normal(ks[3], (input_size,), jnp.float32),
        "wproj": s * jax.random.normal(ks[4], (input_size, input_size), jnp.float32),
        "bproj": s * jax.random.normal(ks[5], (input_size,), jnp.float32),
        "wfcc": s * jax.random.normal(ks[6], (output_class, output_class, input_size),
                                      jnp.float32),
        "bfcc": s * jax.random.normal(ks[7], (output_class,), jnp.float32),
    }


def reference_forward(feats, c, params):
    """Plain-JAX f32 reference mirroring the PyTorch forward (passing_v=True, max_k=1)."""
    dim = params["wq"].shape[0]
    V = jnp.maximum(feats @ params["wv"].T + params["bv"], 0.0)
    Q = feats @ params["wq"].T + params["bq"]
    Qn, Vn = _l2_normalize(Q), _l2_normalize(V)
    idx = jnp.argmax(c, axis=0)                              # top-1 per class
    m_feats = feats[idx]
    q_max = m_feats @ params["wq"].T + params["bq"]
    A = (Qn @ q_max.T) / jnp.sqrt(jnp.float32(dim))
    A = jax.nn.softmax(A, axis=0)
    B = A.T @ Vn
    Bp = B @ params["wproj"].T + params["bproj"]
    C_out = jnp.einsum("oik,ik->o", params["wfcc"], Bp) + params["bfcc"]
    return C_out[None, :], A, Bp[None]


if __name__ == "__main__":
    # Small but representative: N not a multiple of the tile (exercises masking),
    # lane-aligned feature dims, multi-tile / multi-split configs in the sweep.
    N, INPUT_SIZE, OUTPUT_CLASS, DIM = 200, 128, 4, 128

    key = jax.random.PRNGKey(0)
    k_feats, k_c, k_params = jax.random.split(key, 3)
    feats = jax.random.normal(k_feats, (N, INPUT_SIZE), jnp.float32)
    c = jax.random.normal(k_c, (N, OUTPUT_CLASS), jnp.float32)
    params = make_params(k_params, INPUT_SIZE, OUTPUT_CLASS, DIM)

    C_ref, A_ref, B_ref = reference_forward(feats, c, params)

    # f32 sweep over tile sizes / split counts: exercises multi-tile online softmax,
    # partially-padded tiles, a fully-padded split, and the 2-way split merge.
    for tile_n, n_split in [(128, 1), (128, 2), (256, 2), (512, None)]:
        Ck, Ak, Bk = jax.block_until_ready(
            bclassifier_forward(feats, c, params, tile_n=tile_n, n_split=n_split,
                                compute_dtype=jnp.float32))
        assert Ck.shape == (1, OUTPUT_CLASS)
        assert Ak.shape == (N, OUTPUT_CLASS)
        assert Bk.shape == (1, OUTPUT_CLASS, INPUT_SIZE)
        assert jnp.allclose(Ck, C_ref, atol=5e-3, rtol=5e-3)
        assert jnp.allclose(Ak, A_ref, atol=5e-3, rtol=5e-3)
        assert jnp.allclose(Bk, B_ref, atol=5e-3, rtol=5e-3)

    # Default bf16 MXU-input path (f32 accumulation): looser tolerance vs f32 reference.
    Cbf, Abf, Bbf = jax.block_until_ready(bclassifier_forward(feats, c, params))
    assert Cbf.shape == (1, OUTPUT_CLASS)
    assert jnp.allclose(Cbf, C_ref, atol=5e-2, rtol=5e-2)
    assert jnp.allclose(Abf, A_ref, atol=5e-2, rtol=5e-2)
    assert jnp.allclose(Bbf, B_ref, atol=5e-2, rtol=5e-2)

    print("KERNEL_OK")
</pallas_src>

<mosaic_0001>
module attributes {stable_mosaic.version = 11 : i64} {
  func.func @_bclassifier_kernel(%arg0: i32, %arg1: i32, %arg2: memref<128x128xf32, #tpu.memory_space<vmem>>, %arg3: memref<128x256xf32, #tpu.memory_space<vmem>>, %arg4: memref<1x256xf32, #tpu.memory_space<vmem>>, %arg5: memref<4x128xf32, #tpu.memory_space<vmem>>, %arg6: memref<4x128xf32, #tpu.memory_space<vmem>>, %arg7: memref<1x4x1xf32, #tpu.memory_space<vmem>>, %arg8: memref<1x4x1xf32, #tpu.memory_space<vmem>>, %arg9: memref<1x4x128xf32, #tpu.memory_space<vmem>>, %arg10: memref<4x1xf32, #tpu.memory_space<vmem>>, %arg11: memref<4x1xf32, #tpu.memory_space<vmem>>, %arg12: memref<4x128xf32, #tpu.memory_space<vmem>>) attributes {dimension_semantics = [#tpu.dimension_semantics<parallel>, #tpu.dimension_semantics<arbitrary>], iteration_bounds = array<i64: 1, 2>, scalar_prefetch = 0 : i64, scratch_operands = 3 : i64, tpu.core_type = #tpu.core_type<tc>, window_params = [{transform_indices = @transform_0, window_bounds = array<i64: 128, 128>}, {pipeline_mode = #tpu.pipeline_mode<synchronous>, transform_indices = @transform_1, window_bounds = array<i64: 128, 256>}, {pipeline_mode = #tpu.pipeline_mode<synchronous>, transform_indices = @transform_2, window_bounds = array<i64: 1, 256>}, {pipeline_mode = #tpu.pipeline_mode<synchronous>, transform_indices = @transform_3, window_bounds = array<i64: 4, 128>}, {transform_indices = @transform_4, window_bounds = array<i64: 4, 128>}, {transform_indices = @transform_5, window_bounds = array<i64: 1, 4, 1>}, {transform_indices = @transform_6, window_bounds = array<i64: 1, 4, 1>}, {transform_indices = @transform_7, window_bounds = array<i64: 1, 4, 128>}]} {
    %c0_i32 = arith.constant 0 : i32
    %0 = arith.cmpi eq, %arg1, %c0_i32 : i32
    %1 = arith.extui %0 : i1 to i32
    %c0_i32_0 = arith.constant 0 : i32
    %2 = arith.cmpi ne, %1, %c0_i32_0 : i32
    scf.if %2 {
      %cst_22 = arith.constant 0xFF800000 : f32
      %46 = vector.broadcast %cst_22 : f32 to vector<4x1xf32>
      %c0_23 = arith.constant 0 : index
      %c0_24 = arith.constant 0 : index
      %47 = vector.load %arg10[%c0_23, %c0_24] : memref<4x1xf32, #tpu.memory_space<vmem>>, vector<4x1xf32>
      tpu.vector_store %arg10[%c0_23, %c0_24], %46 {strides = array<i32>} : memref<4x1xf32, #tpu.memory_space<vmem>>, vector<4x1xf32>,
      %cst_25 = arith.constant 0.000000e+00 : f32
      %48 = vector.broadcast %cst_25 : f32 to vector<4x1xf32>
      %c0_26 = arith.constant 0 : index
      %c0_27 = arith.constant 0 : index
      %49 = vector.load %arg11[%c0_26, %c0_27] : memref<4x1xf32, #tpu.memory_space<vmem>>, vector<4x1xf32>
      tpu.vector_store %arg11[%c0_26, %c0_27], %48 {strides = array<i32>} : memref<4x1xf32, #tpu.memory_space<vmem>>, vector<4x1xf32>,
      %cst_28 = arith.constant 0.000000e+00 : f32
      %50 = vector.broadcast %cst_28 : f32 to vector<4x128xf32>
      %c0_29 = arith.constant 0 : index
      %c0_30 = arith.constant 0 : index
      %51 = vector.load %arg12[%c0_29, %c0_30] : memref<4x128xf32, #tpu.memory_space<vmem>>, vector<4x128xf32>
      tpu.vector_store %arg12[%c0_29, %c0_30], %50 {strides = array<i32>} : memref<4x128xf32, #tpu.memory_space<vmem>>, vector<4x128xf32>,
    } else {
    }
    %c0 = arith.constant 0 : index
    %c0_1 = arith.constant 0 : index
    %3 = vector.load %arg2[%c0, %c0_1] : memref<128x128xf32, #tpu.memory_space<vmem>>, vector<128x128xf32>
    %c0_2 = arith.constant 0 : index
    %c0_3 = arith.constant 0 : index
    %4 = vector.load %arg3[%c0_2, %c0_3] : memref<128x256xf32, #tpu.memory_space<vmem>>, vector<128x256xf32>
    %cst = arith.constant dense<0.000000e+00> : vector<128x256xf32>
    %5 = tpu.matmul %3, %4, %cst {dimension_numbers = #tpu.dot_dimension_numbers<[1], [0], [0], [1], [0, 0, 1, 1], [], []>} : vector<128x128xf32>, vector<128x256xf32>, vector<128x256xf32> -> vector<128x256xf32>
    %c0_4 = arith.constant 0 : index
    %c0_5 = arith.constant 0 : index
    %6 = vector.load %arg4[%c0_4, %c0_5] : memref<1x256xf32, #tpu.memory_space<vmem>>, vector<1x256xf32>
    %7 = vector.broadcast %6 : vector<1x256xf32> to vector<128x256xf32>
    %8 = arith.addf %5, %7 : vector<128x256xf32>
    %9 = vector.extract_strided_slice %8 {offsets = [0, 0], sizes = [128, 128], strides = [1, 1]} : vector<128x256xf32> to vector<128x128xf32>
    %10 = arith.mulf %9, %9 : vector<128x128xf32>
    %cst_6 = arith.constant dense<0.000000e+00> : vector<128xf32>
    %11 = vector.multi_reduction <add>, %10, %cst_6 [1] : vector<128x128xf32> to vector<128xf32>
    %12 = vector.shape_cast %11 : vector<128xf32> to vector<128x1xf32>
    %cst_7 = arith.constant 1.000000e-24 : f32
    %13 = vector.broadcast %cst_7 : f32 to vector<128x1xf32>
    %14 = arith.maximumf %12, %13 : vector<128x1xf32>
    %15 = math.rsqrt %14 : vector<128x1xf32>
    %16 = vector.broadcast %15 : vector<128x1xf32> to vector<128x128xf32>
    %17 = arith.mulf %9, %16 : vector<128x128xf32>
    %18 = vector.extract_strided_slice %8 {offsets = [0, 128], sizes = [128, 128], strides = [1, 1]} : vector<128x256xf32> to vector<128x128xf32>
    %cst_8 = arith.constant 0.000000e+00 : f32
    %19 = vector.broadcast %cst_8 : f32 to vector<128x128xf32>
    %20 = arith.maximumf %18, %19 : vector<128x128xf32>
    %21 = arith.mulf %20, %20 : vector<128x128xf32>
    %cst_9 = arith.constant dense<0.000000e+00> : vector<128xf32>
    %22 = vector.multi_reduction <add>, %21, %cst_9 [1] : vector<128x128xf32> to vector<128xf32>
    %23 = vector.shape_cast %22 : vector<128xf32> to vector<128x1xf32>
    %cst_10 = arith.constant 1.000000e-24 : f32
    %24 = vector.broadcast %cst_10 : f32 to vector<128x1xf32>
    %25 = arith.maximumf %23, %24 : vector<128x1xf32>
    %26 = math.rsqrt %25 : vector<128x1xf32>
    %27 = vector.broadcast %26 : vector<128x1xf32> to vector<128x128xf32>
    %28 = arith.mulf %20, %27 : vector<128x128xf32>
    %c0_11 = arith.constant 0 : index
    %c0_12 = arith.constant 0 : index
    %29 = vector.load %arg5[%c0_11, %c0_12] : memref<4x128xf32, #tpu.memory_space<vmem>>, vector<4x128xf32>
    %cst_13 = arith.constant dense<0.000000e+00> : vector<4x128xf32>
    %30 = tpu.matmul %29, %17, %cst_13 {dimension_numbers = #tpu.dot_dimension_numbers<[1], [1], [0], [0], [0, 0, 1, 0], [], []>} : vector<4x128xf32>, vector<128x128xf32>, vector<4x128xf32> -> vector<4x128xf32>
    %c0_14 = arith.constant 0 : index
    %c0_15 = arith.constant 0 : index
    %31 = vector.load %arg6[%c0_14, %c0_15] : memref<4x128xf32, #tpu.memory_space<vmem>>, vector<4x128xf32>
    tpu.vector_store %arg6[%c0_14, %c0_15], %30 {strides = array<i32>} : memref<4x128xf32, #tpu.memory_space<vmem>>, vector<4x128xf32>,
    %c2_i32 = arith.constant 2 : i32
    %32 = arith.muli %arg0, %c2_i32 : i32
    %33 = arith.addi %32, %arg1 : i32
    %c128_i32 = arith.constant 128 : i32
    %34 = arith.muli %33, %c128_i32 : i32
    %c128_i32_16 = arith.constant 128 : i32
    %35 = arith.addi %34, %c128_i32_16 : i32
    %c200_i32 = arith.constant 200 : i32
    %36 = arith.cmpi sle, %35, %c200_i32 : i32
    %37 = arith.extui %36 : i1 to i32
    %c0_i32_17 = arith.constant 0 : i32
    %38 = arith.cmpi ne, %37, %c0_i32_17 : i32
    scf.if %38 {
      %c0_22 = arith.constant 0 : index
      %c0_23 = arith.constant 0 : index
      %46 = vector.load %arg10[%c0_22, %c0_23] : memref<4x1xf32, #tpu.memory_space<vmem>>, vector<4x1xf32>
      %cst_24 = arith.constant dense<0xFF800000> : vector<4xf32>
      %47 = vector.multi_reduction <maximumf>, %30, %cst_24 [1] : vector<4x128xf32> to vector<4xf32>
      %48 = vector.shape_cast %47 : vector<4xf32> to vector<4x1xf32>
      %49 = arith.maximumf %46, %48 : vector<4x1xf32>
      %50 = arith.subf %46, %49 : vector<4x1xf32>
      %51 = math.exp %50 : vector<4x1xf32>
      %52 = vector.broadcast %49 : vector<4x1xf32> to vector<4x128xf32>
      %53 = arith.subf %30, %52 : vector<4x128xf32>
      %54 = math.exp %53 : vector<4x128xf32>
      %c0_25 = arith.constant 0 : index
      %c0_26 = arith.constant 0 : index
      %55 = vector.load %arg11[%c0_25, %c0_26] : memref<4x1xf32, #tpu.memory_space<vmem>>, vector<4x1xf32>
      %56 = arith.mulf %51, %55 : vector<4x1xf32>
      %cst_27 = arith.constant dense<0.000000e+00> : vector<4xf32>
      %57 = vector.multi_reduction <add>, %54, %cst_27 [1] : vector<4x128xf32> to vector<4xf32>
      %58 = vector.shape_cast %57 : vector<4xf32> to vector<4x1xf32>
      %59 = arith.addf %56, %58 : vector<4x1xf32>
      %c0_28 = arith.constant 0 : index
      %c0_29 = arith.constant 0 : index
      %60 = vector.load %arg11[%c0_28, %c0_29] : memref<4x1xf32, #tpu.memory_space<vmem>>, vector<4x1xf32>
      tpu.vector_store %arg11[%c0_28, %c0_29], %59 {strides = array<i32>} : memref<4x1xf32, #tpu.memory_space<vmem>>, vector<4x1xf32>,
      %c0_30 = arith.constant 0 : index
      %c0_31 = arith.constant 0 : index
      %61 = vector.load %arg12[%c0_30, %c0_31] : memref<4x128xf32, #tpu.memory_space<vmem>>, vector<4x128xf32>
      %62 = vector.broadcast %51 : vector<4x1xf32> to vector<4x128xf32>
      %63 = arith.mulf %62, %61 : vector<4x128xf32>
      %cst_32 = arith.constant dense<0.000000e+00> : vector<4x128xf32>
      %64 = tpu.matmul %54, %28, %cst_32 {dimension_numbers = #tpu.dot_dimension_numbers<[1], [0], [0], [1], [0, 0, 1, 1], [], []>} : vector<4x128xf32>, vector<128x128xf32>, vector<4x128xf32> -> vector<4x128xf32>
      %65 = arith.addf %63, %64 : vector<4x128xf32>
      %c0_33 = arith.constant 0 : index
      %c0_34 = arith.constant 0 : index
      %66 = vector.load %arg12[%c0_33, %c0_34] : memref<4x128xf32, #tpu.memory_space<vmem>>, vector<4x128xf32>
      tpu.vector_store %arg12[%c0_33, %c0_34], %65 {strides = array<i32>} : memref<4x128xf32, #tpu.memory_space<vmem>>, vector<4x128xf32>,
      %c0_35 = arith.constant 0 : index
      %c0_36 = arith.constant 0 : index
      %67 = vector.load %arg10[%c0_35, %c0_36] : memref<4x1xf32, #tpu.memory_space<vmem>>, vector<4x1xf32>
      tpu.vector_store %arg10[%c0_35, %c0_36], %49 {strides = array<i32>} : memref<4x1xf32, #tpu.memory_space<vmem>>, vector<4x1xf32>,
    } else {
    }
    %c128_i32_18 = arith.constant 128 : i32
    %39 = arith.addi %34, %c128_i32_18 : i32
    %c200_i32_19 = arith.constant 200 : i32
    %40 = arith.cmpi sgt, %39, %c200_i32_19 : i32
    %41 = arith.extui %40 : i1 to i32
    %c0_i32_20 = arith.constant 0 : i32
    %42 = arith.cmpi ne, %41, %c0_i32_20 : i32
    scf.if %42 {
      %46 = tpu.iota {dimensions = array<i32: 1>} : vector<4x128xi32>
      %47 = vector.broadcast %34 : i32 to vector<4x128xi32>
      %48 = arith.addi %47, %46 : vector<4x128xi32>
      %c200_i32_22 = arith.constant 200 : i32
      %49 = vector.broadcast %c200_i32_22 : i32 to vector<4x128xi32>
      %50 = arith.cmpi slt, %48, %49 : vector<4x128xi32>
      %cst_23 = arith.constant -1.000000e+30 : f32
      %51 = vector.broadcast %cst_23 : f32 to vector<4x128xf32>
      %52 = arith.select %50, %30, %51 : vector<4x128xi1>, vector<4x128xf32>
      %c0_24 = arith.constant 0 : index
      %c0_25 = arith.constant 0 : index
      %53 = vector.load %arg10[%c0_24, %c0_25] : memref<4x1xf32, #tpu.memory_space<vmem>>, vector<4x1xf32>
      %cst_26 = arith.constant dense<0xFF800000> : vector<4xf32>
      %54 = vector.multi_reduction <maximumf>, %52, %cst_26 [1] : vector<4x128xf32> to vector<4xf32>
      %55 = vector.shape_cast %54 : vector<4xf32> to vector<4x1xf32>
      %56 = arith.maximumf %53, %55 : vector<4x1xf32>
      %57 = arith.subf %53, %56 : vector<4x1xf32>
      %58 = math.exp %57 : vector<4x1xf32>
      %59 = vector.broadcast %56 : vector<4x1xf32> to vector<4x128xf32>
      %60 = arith.subf %52, %59 : vector<4x128xf32>
      %61 = math.exp %60 : vector<4x128xf32>
      %c0_27 = arith.constant 0 : index
      %c0_28 = arith.constant 0 : index
      %62 = vector.load %arg11[%c0_27, %c0_28] : memref<4x1xf32, #tpu.memory_space<vmem>>, vector<4x1xf32>
      %63 = arith.mulf %58, %62 : vector<4x1xf32>
      %cst_29 = arith.constant dense<0.000000e+00> : vector<4xf32>
      %64 = vector.multi_reduction <add>, %61, %cst_29 [1] : vector<4x128xf32> to vector<4xf32>
      %65 = vector.shape_cast %64 : vector<4xf32> to vector<4x1xf32>
      %66 = arith.addf %63, %65 : vector<4x1xf32>
      %c0_30 = arith.constant 0 : index
      %c0_31 = arith.constant 0 : index
      %67 = vector.load %arg11[%c0_30, %c0_31] : memref<4x1xf32, #tpu.memory_space<vmem>>, vector<4x1xf32>
      tpu.vector_store %arg11[%c0_30, %c0_31], %66 {strides = array<i32>} : memref<4x1xf32, #tpu.memory_space<vmem>>, vector<4x1xf32>,
      %c0_32 = arith.constant 0 : index
      %c0_33 = arith.constant 0 : index
      %68 = vector.load %arg12[%c0_32, %c0_33] : memref<4x128xf32, #tpu.memory_space<vmem>>, vector<4x128xf32>
      %69 = vector.broadcast %58 : vector<4x1xf32> to vector<4x128xf32>
      %70 = arith.mulf %69, %68 : vector<4x128xf32>
      %cst_34 = arith.constant dense<0.000000e+00> : vector<4x128xf32>
      %71 = tpu.matmul %61, %28, %cst_34 {dimension_numbers = #tpu.dot_dimension_numbers<[1], [0], [0], [1], [0, 0, 1, 1], [], []>} : vector<4x128xf32>, vector<128x128xf32>, vector<4x128xf32> -> vector<4x128xf32>
      %72 = arith.addf %70, %71 : vector<4x128xf32>
      %c0_35 = arith.constant 0 : index
      %c0_36 = arith.constant 0 : index
      %73 = vector.load %arg12[%c0_35, %c0_36] : memref<4x128xf32, #tpu.memory_space<vmem>>, vector<4x128xf32>
      tpu.vector_store %arg12[%c0_35, %c0_36], %72 {strides = array<i32>} : memref<4x128xf32, #tpu.memory_space<vmem>>, vector<4x128xf32>,
      %c0_37 = arith.constant 0 : index
      %c0_38 = arith.constant 0 : index
      %74 = vector.load %arg10[%c0_37, %c0_38] : memref<4x1xf32, #tpu.memory_space<vmem>>, vector<4x1xf32>
      tpu.vector_store %arg10[%c0_37, %c0_38], %56 {strides = array<i32>} : memref<4x1xf32, #tpu.memory_space<vmem>>, vector<4x1xf32>,
    } else {
    }
    %c1_i32 = arith.constant 1 : i32
    %43 = arith.cmpi eq, %arg1, %c1_i32 : i32
    %44 = arith.extui %43 : i1 to i32
    %c0_i32_21 = arith.constant 0 : i32
    %45 = arith.cmpi ne, %44, %c0_i32_21 : i32
    scf.if %45 {
      %c0_22 = arith.constant 0 : index
      %c0_23 = arith.constant 0 : index
      %46 = vector.load %arg10[%c0_22, %c0_23] : memref<4x1xf32, #tpu.memory_space<vmem>>, vector<4x1xf32>
      %c0_24 = arith.constant 0 : index
      %c0_25 = arith.constant 0 : index
      %c0_26 = arith.constant 0 : index
      %47 = vector.load %arg7[%c0_24, %c0_25, %c0_26] : memref<1x4x1xf32, #tpu.memory_space<vmem>>, vector<1x4x1xf32>
      %48 = vector.shape_cast %47 : vector<1x4x1xf32> to vector<4x1xf32>
      %49 = vector.shape_cast %46 : vector<4x1xf32> to vector<1x4x1xf32>
      tpu.vector_store %arg7[%c0_24, %c0_25, %c0_26], %49 {strides = array<i32>} : memref<1x4x1xf32, #tpu.memory_space<vmem>>, vector<1x4x1xf32>,
      %c0_27 = arith.constant 0 : index
      %c0_28 = arith.constant 0 : index
      %50 = vector.load %arg11[%c0_27, %c0_28] : memref<4x1xf32, #tpu.memory_space<vmem>>, vector<4x1xf32>
      %c0_29 = arith.constant 0 : index
      %c0_30 = arith.constant 0 : index
      %c0_31 = arith.constant 0 : index
      %51 = vector.load %arg8[%c0_29, %c0_30, %c0_31] : memref<1x4x1xf32, #tpu.memory_space<vmem>>, vector<1x4x1xf32>
      %52 = vector.shape_cast %51 : vector<1x4x1xf32> to vector<4x1xf32>
      %53 = vector.shape_cast %50 : vector<4x1xf32> to vector<1x4x1xf32>
      tpu.vector_store %arg8[%c0_29, %c0_30, %c0_31], %53 {strides = array<i32>} : memref<1x4x1xf32, #tpu.memory_space<vmem>>, vector<1x4x1xf32>,
      %c0_32 = arith.constant 0 : index
      %c0_33 = arith.constant 0 : index
      %54 = vector.load %arg12[%c0_32, %c0_33] : memref<4x128xf32, #tpu.memory_space<vmem>>, vector<4x128xf32>
      %c0_34 = arith.constant 0 : index
      %c0_35 = arith.constant 0 : index
      %c0_36 = arith.constant 0 : index
      %55 = vector.load %arg9[%c0_34, %c0_35, %c0_36] : memref<1x4x128xf32, #tpu.memory_space<vmem>>, vector<1x4x128xf32>
      %56 = vector.shape_cast %55 : vector<1x4x128xf32> to vector<4x128xf32>
      %57 = vector.shape_cast %54 : vector<4x128xf32> to vector<1x4x128xf32>
      tpu.vector_store %arg9[%c0_34, %c0_35, %c0_36], %57 {strides = array<i32>} : memref<1x4x128xf32, #tpu.memory_space<vmem>>, vector<1x4x128xf32>,
    } else {
    }
    return
  }
  func.func @transform_0(%arg0: i32, %arg1: i32) -> (i32, i32) {
    %c2_i32 = arith.constant 2 : i32
    %0 = arith.muli %arg0, %c2_i32 : i32
    %1 = arith.addi %0, %arg1 : i32
    %c0_i32 = arith.constant 0 : i32
    %c0_i32_0 = arith.constant 0 : i32
    return %1, %c0_i32 : i32, i32
  }
  func.func @transform_1(%arg0: i32, %arg1: i32) -> (i32, i32) {
    %c0_i32 = arith.constant 0 : i32
    %c0_i32_0 = arith.constant 0 : i32
    %c0_i32_1 = arith.constant 0 : i32
    return %c0_i32, %c0_i32_0 : i32, i32
  }
  func.func @transform_2(%arg0: i32, %arg1: i32) -> (i32, i32) {
    %c0_i32 = arith.constant 0 : i32
    %c0_i32_0 = arith.constant 0 : i32
    %c0_i32_1 = arith.constant 0 : i32
    return %c0_i32, %c0_i32_0 : i32, i32
  }
  func.func @transform_3(%arg0: i32, %arg1: i32) -> (i32, i32) {
    %c0_i32 = arith.constant 0 : i32
    %c0_i32_0 = arith.constant 0 : i32
    %c0_i32_1 = arith.constant 0 : i32
    return %c0_i32, %c0_i32_0 : i32, i32
  }
  func.func @transform_4(%arg0: i32, %arg1: i32) -> (i32, i32) {
    %c2_i32 = arith.constant 2 : i32
    %0 = arith.muli %arg0, %c2_i32 : i32
    %1 = arith.addi %0, %arg1 : i32
    %c0_i32 = arith.constant 0 : i32
    %c0_i32_0 = arith.constant 0 : i32
    return %c0_i32, %1 : i32, i32
  }
  func.func @transform_5(%arg0: i32, %arg1: i32) -> (i32, i32, i32) {
    %c0_i32 = arith.constant 0 : i32
    %c0_i32_0 = arith.constant 0 : i32
    %c0_i32_1 = arith.constant 0 : i32
    return %arg0, %c0_i32, %c0_i32_0 : i32, i32, i32
  }
  func.func @transform_6(%arg0: i32, %arg1: i32) -> (i32, i32, i32) {
    %c0_i32 = arith.constant 0 : i32
    %c0_i32_0 = arith.constant 0 : i32
    %c0_i32_1 = arith.constant 0 : i32
    return %arg0, %c0_i32, %c0_i32_0 : i32, i32, i32
  }
  func.func @transform_7(%arg0: i32, %arg1: i32) -> (i32, i32, i32) {
    %c0_i32 = arith.constant 0 : i32
    %c0_i32_0 = arith.constant 0 : i32
    %c0_i32_1 = arith.constant 0 : i32
    return %arg0, %c0_i32, %c0_i32_0 : i32, i32, i32
  }
}

module attributes {stable_mosaic.version = 11 : i64} {
  func.func @_bclassifier_kernel(%arg0: i32, %arg1: i32, %arg2: memref<128x128xf32, #tpu.memory_space<vmem>>, %arg3: memref<128x256xf32, #tpu.memory_space<vmem>>, %arg4: memref<1x256xf32, #tpu.memory_space<vmem>>, %arg5: memref<4x128xf32, #tpu.memory_space<vmem>>, %arg6: memref<4x128xf32, #tpu.memory_space<vmem>>, %arg7: memref<1x4x1xf32, #tpu.memory_space<vmem>>, %arg8: memref<1x4x1xf32, #tpu.memory_space<vmem>>, %arg9: memref<1x4x128xf32, #tpu.memory_space<vmem>>, %arg10: memref<4x1xf32, #tpu.memory_space<vmem>>, %arg11: memref<4x1xf32, #tpu.memory_space<vmem>>, %arg12: memref<4x128xf32, #tpu.memory_space<vmem>>) attributes {dimension_semantics = [#tpu.dimension_semantics<parallel>, #tpu.dimension_semantics<arbitrary>], iteration_bounds = array<i64: 1, 2>, scalar_prefetch = 0 : i64, scratch_operands = 3 : i64, tpu.core_type = #tpu.core_type<tc>, window_params = [{transform_indices = @transform_0, window_bounds = array<i64: 128, 128>}, {pipeline_mode = #tpu.pipeline_mode<synchronous>, transform_indices = @transform_1, window_bounds = array<i64: 128, 256>}, {pipeline_mode = #tpu.pipeline_mode<synchronous>, transform_indices = @transform_2, window_bounds = array<i64: 1, 256>}, {pipeline_mode = #tpu.pipeline_mode<synchronous>, transform_indices = @transform_3, window_bounds = array<i64: 4, 128>}, {transform_indices = @transform_4, window_bounds = array<i64: 4, 128>}, {transform_indices = @transform_5, window_bounds = array<i64: 1, 4, 1>}, {transform_indices = @transform_6, window_bounds = array<i64: 1, 4, 1>}, {transform_indices = @transform_7, window_bounds = array<i64: 1, 4, 128>}]} {
    %c0_i32 = arith.constant 0 : i32
    %0 = arith.cmpi eq, %arg1, %c0_i32 : i32
    %1 = arith.extui %0 : i1 to i32
    %c0_i32_0 = arith.constant 0 : i32
    %2 = arith.cmpi ne, %1, %c0_i32_0 : i32
    scf.if %2 {
      %cst_22 = arith.constant 0xFF800000 : f32
      %46 = vector.broadcast %cst_22 : f32 to vector<4x1xf32>
      %c0_23 = arith.constant 0 : index
      %c0_24 = arith.constant 0 : index
      %47 = vector.load %arg10[%c0_23, %c0_24] : memref<4x1xf32, #tpu.memory_space<vmem>>, vector<4x1xf32>
      tpu.vector_store %arg10[%c0_23, %c0_24], %46 {strides = array<i32>} : memref<4x1xf32, #tpu.memory_space<vmem>>, vector<4x1xf32>,
      %cst_25 = arith.constant 0.000000e+00 : f32
      %48 = vector.broadcast %cst_25 : f32 to vector<4x1xf32>
      %c0_26 = arith.constant 0 : index
      %c0_27 = arith.constant 0 : index
      %49 = vector.load %arg11[%c0_26, %c0_27] : memref<4x1xf32, #tpu.memory_space<vmem>>, vector<4x1xf32>
      tpu.vector_store %arg11[%c0_26, %c0_27], %48 {strides = array<i32>} : memref<4x1xf32, #tpu.memory_space<vmem>>, vector<4x1xf32>,
      %cst_28 = arith.constant 0.000000e+00 : f32
      %50 = vector.broadcast %cst_28 : f32 to vector<4x128xf32>
      %c0_29 = arith.constant 0 : index
      %c0_30 = arith.constant 0 : index
      %51 = vector.load %arg12[%c0_29, %c0_30] : memref<4x128xf32, #tpu.memory_space<vmem>>, vector<4x128xf32>
      tpu.vector_store %arg12[%c0_29, %c0_30], %50 {strides = array<i32>} : memref<4x128xf32, #tpu.memory_space<vmem>>, vector<4x128xf32>,
    } else {
    }
    %c0 = arith.constant 0 : index
    %c0_1 = arith.constant 0 : index
    %3 = vector.load %arg2[%c0, %c0_1] : memref<128x128xf32, #tpu.memory_space<vmem>>, vector<128x128xf32>
    %c0_2 = arith.constant 0 : index
    %c0_3 = arith.constant 0 : index
    %4 = vector.load %arg3[%c0_2, %c0_3] : memref<128x256xf32, #tpu.memory_space<vmem>>, vector<128x256xf32>
    %cst = arith.constant dense<0.000000e+00> : vector<128x256xf32>
    %5 = tpu.matmul %3, %4, %cst {dimension_numbers = #tpu.dot_dimension_numbers<[1], [0], [0], [1], [0, 0, 1, 1], [], []>} : vector<128x128xf32>, vector<128x256xf32>, vector<128x256xf32> -> vector<128x256xf32>
    %c0_4 = arith.constant 0 : index
    %c0_5 = arith.constant 0 : index
    %6 = vector.load %arg4[%c0_4, %c0_5] : memref<1x256xf32, #tpu.memory_space<vmem>>, vector<1x256xf32>
    %7 = vector.broadcast %6 : vector<1x256xf32> to vector<128x256xf32>
    %8 = arith.addf %5, %7 : vector<128x256xf32>
    %9 = vector.extract_strided_slice %8 {offsets = [0, 0], sizes = [128, 128], strides = [1, 1]} : vector<128x256xf32> to vector<128x128xf32>
    %10 = arith.mulf %9, %9 : vector<128x128xf32>
    %cst_6 = arith.constant dense<0.000000e+00> : vector<128xf32>
    %11 = vector.multi_reduction <add>, %10, %cst_6 [1] : vector<128x128xf32> to vector<128xf32>
    %12 = vector.shape_cast %11 : vector<128xf32> to vector<128x1xf32>
    %cst_7 = arith.constant 1.000000e-24 : f32
    %13 = vector.broadcast %cst_7 : f32 to vector<128x1xf32>
    %14 = arith.maximumf %12, %13 : vector<128x1xf32>
    %15 = math.rsqrt %14 : vector<128x1xf32>
    %16 = vector.broadcast %15 : vector<128x1xf32> to vector<128x128xf32>
    %17 = arith.mulf %9, %16 : vector<128x128xf32>
    %18 = vector.extract_strided_slice %8 {offsets = [0, 128], sizes = [128, 128], strides = [1, 1]} : vector<128x256xf32> to vector<128x128xf32>
    %cst_8 = arith.constant 0.000000e+00 : f32
    %19 = vector.broadcast %cst_8 : f32 to vector<128x128xf32>
    %20 = arith.maximumf %18, %19 : vector<128x128xf32>
    %21 = arith.mulf %20, %20 : vector<128x128xf32>
    %cst_9 = arith.constant dense<0.000000e+00> : vector<128xf32>
    %22 = vector.multi_reduction <add>, %21, %cst_9 [1] : vector<128x128xf32> to vector<128xf32>
    %23 = vector.shape_cast %22 : vector<128xf32> to vector<128x1xf32>
    %cst_10 = arith.constant 1.000000e-24 : f32
    %24 = vector.broadcast %cst_10 : f32 to vector<128x1xf32>
    %25 = arith.maximumf %23, %24 : vector<128x1xf32>
    %26 = math.rsqrt %25 : vector<128x1xf32>
    %27 = vector.broadcast %26 : vector<128x1xf32> to vector<128x128xf32>
    %28 = arith.mulf %20, %27 : vector<128x128xf32>
    %c0_11 = arith.constant 0 : index
    %c0_12 = arith.constant 0 : index
    %29 = vector.load %arg5[%c0_11, %c0_12] : memref<4x128xf32, #tpu.memory_space<vmem>>, vector<4x128xf32>
    %cst_13 = arith.constant dense<0.000000e+00> : vector<4x128xf32>
    %30 = tpu.matmul %29, %17, %cst_13 {dimension_numbers = #tpu.dot_dimension_numbers<[1], [1], [0], [0], [0, 0, 1, 0], [], []>} : vector<4x128xf32>, vector<128x128xf32>, vector<4x128xf32> -> vector<4x128xf32>
    %c0_14 = arith.constant 0 : index
    %c0_15 = arith.constant 0 : index
    %31 = vector.load %arg6[%c0_14, %c0_15] : memref<4x128xf32, #tpu.memory_space<vmem>>, vector<4x128xf32>
    tpu.vector_store %arg6[%c0_14, %c0_15], %30 {strides = array<i32>} : memref<4x128xf32, #tpu.memory_space<vmem>>, vector<4x128xf32>,
    %c2_i32 = arith.constant 2 : i32
    %32 = arith.muli %arg0, %c2_i32 : i32
    %33 = arith.addi %32, %arg1 : i32
    %c128_i32 = arith.constant 128 : i32
    %34 = arith.muli %33, %c128_i32 : i32
    %c128_i32_16 = arith.constant 128 : i32
    %35 = arith.addi %34, %c128_i32_16 : i32
    %c200_i32 = arith.constant 200 : i32
    %36 = arith.cmpi sle, %35, %c200_i32 : i32
    %37 = arith.extui %36 : i1 to i32
    %c0_i32_17 = arith.constant 0 : i32
    %38 = arith.cmpi ne, %37, %c0_i32_17 : i32
    scf.if %38 {
      %c0_22 = arith.constant 0 : index
      %c0_23 = arith.constant 0 : index
      %46 = vector.load %arg10[%c0_22, %c0_23] : memref<4x1xf32, #tpu.memory_space<vmem>>, vector<4x1xf32>
      %cst_24 = arith.constant dense<0xFF800000> : vector<4xf32>
      %47 = vector.multi_reduction <maximumf>, %30, %cst_24 [1] : vector<4x128xf32> to vector<4xf32>
      %48 = vector.shape_cast %47 : vector<4xf32> to vector<4x1xf32>
      %49 = arith.maximumf %46, %48 : vector<4x1xf32>
      %50 = arith.subf %46, %49 : vector<4x1xf32>
      %51 = math.exp %50 : vector<4x1xf32>
      %52 = vector.broadcast %49 : vector<4x1xf32> to vector<4x128xf32>
      %53 = arith.subf %30, %52 : vector<4x128xf32>
      %54 = math.exp %53 : vector<4x128xf32>
      %c0_25 = arith.constant 0 : index
      %c0_26 = arith.constant 0 : index
      %55 = vector.load %arg11[%c0_25, %c0_26] : memref<4x1xf32, #tpu.memory_space<vmem>>, vector<4x1xf32>
      %56 = arith.mulf %51, %55 : vector<4x1xf32>
      %cst_27 = arith.constant dense<0.000000e+00> : vector<4xf32>
      %57 = vector.multi_reduction <add>, %54, %cst_27 [1] : vector<4x128xf32> to vector<4xf32>
      %58 = vector.shape_cast %57 : vector<4xf32> to vector<4x1xf32>
      %59 = arith.addf %56, %58 : vector<4x1xf32>
      %c0_28 = arith.constant 0 : index
      %c0_29 = arith.constant 0 : index
      %60 = vector.load %arg11[%c0_28, %c0_29] : memref<4x1xf32, #tpu.memory_space<vmem>>, vector<4x1xf32>
      tpu.vector_store %arg11[%c0_28, %c0_29], %59 {strides = array<i32>} : memref<4x1xf32, #tpu.memory_space<vmem>>, vector<4x1xf32>,
      %c0_30 = arith.constant 0 : index
      %c0_31 = arith.constant 0 : index
      %61 = vector.load %arg12[%c0_30, %c0_31] : memref<4x128xf32, #tpu.memory_space<vmem>>, vector<4x128xf32>
      %62 = vector.broadcast %51 : vector<4x1xf32> to vector<4x128xf32>
      %63 = arith.mulf %62, %61 : vector<4x128xf32>
      %cst_32 = arith.constant dense<0.000000e+00> : vector<4x128xf32>
      %64 = tpu.matmul %54, %28, %cst_32 {dimension_numbers = #tpu.dot_dimension_numbers<[1], [0], [0], [1], [0, 0, 1, 1], [], []>} : vector<4x128xf32>, vector<128x128xf32>, vector<4x128xf32> -> vector<4x128xf32>
      %65 = arith.addf %63, %64 : vector<4x128xf32>
      %c0_33 = arith.constant 0 : index
      %c0_34 = arith.constant 0 : index
      %66 = vector.load %arg12[%c0_33, %c0_34] : memref<4x128xf32, #tpu.memory_space<vmem>>, vector<4x128xf32>
      tpu.vector_store %arg12[%c0_33, %c0_34], %65 {strides = array<i32>} : memref<4x128xf32, #tpu.memory_space<vmem>>, vector<4x128xf32>,
      %c0_35 = arith.constant 0 : index
      %c0_36 = arith.constant 0 : index
      %67 = vector.load %arg10[%c0_35, %c0_36] : memref<4x1xf32, #tpu.memory_space<vmem>>, vector<4x1xf32>
      tpu.vector_store %arg10[%c0_35, %c0_36], %49 {strides = array<i32>} : memref<4x1xf32, #tpu.memory_space<vmem>>, vector<4x1xf32>,
    } else {
    }
    %c128_i32_18 = arith.constant 128 : i32
    %39 = arith.addi %34, %c128_i32_18 : i32
    %c200_i32_19 = arith.constant 200 : i32
    %40 = arith.cmpi sgt, %39, %c200_i32_19 : i32
    %41 = arith.extui %40 : i1 to i32
    %c0_i32_20 = arith.constant 0 : i32
    %42 = arith.cmpi ne, %41, %c0_i32_20 : i32
    scf.if %42 {
      %46 = tpu.iota {dimensions = array<i32: 1>} : vector<4x128xi32>
      %47 = vector.broadcast %34 : i32 to vector<4x128xi32>
      %48 = arith.addi %47, %46 : vector<4x128xi32>
      %c200_i32_22 = arith.constant 200 : i32
      %49 = vector.broadcast %c200_i32_22 : i32 to vector<4x128xi32>
      %50 = arith.cmpi slt, %48, %49 : vector<4x128xi32>
      %cst_23 = arith.constant -1.000000e+30 : f32
      %51 = vector.broadcast %cst_23 : f32 to vector<4x128xf32>
      %52 = arith.select %50, %30, %51 : vector<4x128xi1>, vector<4x128xf32>
      %c0_24 = arith.constant 0 : index
      %c0_25 = arith.constant 0 : index
      %53 = vector.load %arg10[%c0_24, %c0_25] : memref<4x1xf32, #tpu.memory_space<vmem>>, vector<4x1xf32>
      %cst_26 = arith.constant dense<0xFF800000> : vector<4xf32>
      %54 = vector.multi_reduction <maximumf>, %52, %cst_26 [1] : vector<4x128xf32> to vector<4xf32>
      %55 = vector.shape_cast %54 : vector<4xf32> to vector<4x1xf32>
      %56 = arith.maximumf %53, %55 : vector<4x1xf32>
      %57 = arith.subf %53, %56 : vector<4x1xf32>
      %58 = math.exp %57 : vector<4x1xf32>
      %59 = vector.broadcast %56 : vector<4x1xf32> to vector<4x128xf32>
      %60 = arith.subf %52, %59 : vector<4x128xf32>
      %61 = math.exp %60 : vector<4x128xf32>
      %c0_27 = arith.constant 0 : index
      %c0_28 = arith.constant 0 : index
      %62 = vector.load %arg11[%c0_27, %c0_28] : memref<4x1xf32, #tpu.memory_space<vmem>>, vector<4x1xf32>
      %63 = arith.mulf %58, %62 : vector<4x1xf32>
      %cst_29 = arith.constant dense<0.000000e+00> : vector<4xf32>
      %64 = vector.multi_reduction <add>, %61, %cst_29 [1] : vector<4x128xf32> to vector<4xf32>
      %65 = vector.shape_cast %64 : vector<4xf32> to vector<4x1xf32>
      %66 = arith.addf %63, %65 : vector<4x1xf32>
      %c0_30 = arith.constant 0 : index
      %c0_31 = arith.constant 0 : index
      %67 = vector.load %arg11[%c0_30, %c0_31] : memref<4x1xf32, #tpu.memory_space<vmem>>, vector<4x1xf32>
      tpu.vector_store %arg11[%c0_30, %c0_31], %66 {strides = array<i32>} : memref<4x1xf32, #tpu.memory_space<vmem>>, vector<4x1xf32>,
      %c0_32 = arith.constant 0 : index
      %c0_33 = arith.constant 0 : index
      %68 = vector.load %arg12[%c0_32, %c0_33] : memref<4x128xf32, #tpu.memory_space<vmem>>, vector<4x128xf32>
      %69 = vector.broadcast %58 : vector<4x1xf32> to vector<4x128xf32>
      %70 = arith.mulf %69, %68 : vector<4x128xf32>
      %cst_34 = arith.constant dense<0.000000e+00> : vector<4x128xf32>
      %71 = tpu.matmul %61, %28, %cst_34 {dimension_numbers = #tpu.dot_dimension_numbers<[1], [0], [0], [1], [0, 0, 1, 1], [], []>} : vector<4x128xf32>, vector<128x128xf32>, vector<4x128xf32> -> vector<4x128xf32>
      %72 = arith.addf %70, %71 : vector<4x128xf32>
      %c0_35 = arith.constant 0 : index
      %c0_36 = arith.constant 0 : index
      %73 = vector.load %arg12[%c0_35, %c0_36] : memref<4x128xf32, #tpu.memory_space<vmem>>, vector<4x128xf32>
      tpu.vector_store %arg12[%c0_35, %c0_36], %72 {strides = array<i32>} : memref<4x128xf32, #tpu.memory_space<vmem>>, vector<4x128xf32>,
      %c0_37 = arith.constant 0 : index
      %c0_38 = arith.constant 0 : index
      %74 = vector.load %arg10[%c0_37, %c0_38] : memref<4x1xf32, #tpu.memory_space<vmem>>, vector<4x1xf32>
      tpu.vector_store %arg10[%c0_37, %c0_38], %56 {strides = array<i32>} : memref<4x1xf32, #tpu.memory_space<vmem>>, vector<4x1xf32>,
    } else {
    }
    %c1_i32 = arith.constant 1 : i32
    %43 = arith.cmpi eq, %arg1, %c1_i32 : i32
    %44 = arith.extui %43 : i1 to i32
    %c0_i32_21 = arith.constant 0 : i32
    %45 = arith.cmpi ne, %44, %c0_i32_21 : i32
    scf.if %45 {
      %c0_22 = arith.constant 0 : index
      %c0_23 = arith.constant 0 : index
      %46 = vector.load %arg10[%c0_22, %c0_23] : memref<4x1xf32, #tpu.memory_space<vmem>>, vector<4x1xf32>
      %c0_24 = arith.constant 0 : index
      %c0_25 = arith.constant 0 : index
      %c0_26 = arith.constant 0 : index
      %47 = vector.load %arg7[%c0_24, %c0_25, %c0_26] : memref<1x4x1xf32, #tpu.memory_space<vmem>>, vector<1x4x1xf32>
      %48 = vector.shape_cast %47 : vector<1x4x1xf32> to vector<4x1xf32>
      %49 = vector.shape_cast %46 : vector<4x1xf32> to vector<1x4x1xf32>
      tpu.vector_store %arg7[%c0_24, %c0_25, %c0_26], %49 {strides = array<i32>} : memref<1x4x1xf32, #tpu.memory_space<vmem>>, vector<1x4x1xf32>,
      %c0_27 = arith.constant 0 : index
      %c0_28 = arith.constant 0 : index
      %50 = vector.load %arg11[%c0_27, %c0_28] : memref<4x1xf32, #tpu.memory_space<vmem>>, vector<4x1xf32>
      %c0_29 = arith.constant 0 : index
      %c0_30 = arith.constant 0 : index
      %c0_31 = arith.constant 0 : index
      %51 = vector.load %arg8[%c0_29, %c0_30, %c0_31] : memref<1x4x1xf32, #tpu.memory_space<vmem>>, vector<1x4x1xf32>
      %52 = vector.shape_cast %51 : vector<1x4x1xf32> to vector<4x1xf32>
      %53 = vector.shape_cast %50 : vector<4x1xf32> to vector<1x4x1xf32>
      tpu.vector_store %arg8[%c0_29, %c0_30, %c0_31], %53 {strides = array<i32>} : memref<1x4x1xf32, #tpu.memory_space<vmem>>, vector<1x4x1xf32>,
      %c0_32 = arith.constant 0 : index
      %c0_33 = arith.constant 0 : index
      %54 = vector.load %arg12[%c0_32, %c0_33] : memref<4x128xf32, #tpu.memory_space<vmem>>, vector<4x128xf32>
      %c0_34 = arith.constant 0 : index
      %c0_35 = arith.constant 0 : index
      %c0_36 = arith.constant 0 : index
      %55 = vector.load %arg9[%c0_34, %c0_35, %c0_36] : memref<1x4x128xf32, #tpu.memory_space<vmem>>, vector<1x4x128xf32>
      %56 = vector.shape_cast %55 : vector<1x4x128xf32> to vector<4x128xf32>
      %57 = vector.shape_cast %54 : vector<4x128xf32> to vector<1x4x128xf32>
      tpu.vector_store %arg9[%c0_34, %c0_35, %c0_36], %57 {strides = array<i32>} : memref<1x4x128xf32, #tpu.memory_space<vmem>>, vector<1x4x128xf32>,
    } else {
    }
    return
  }
  func.func @transform_0(%arg0: i32, %arg1: i32) -> (i32, i32) {
    %c2_i32 = arith.constant 2 : i32
    %0 = arith.muli %arg0, %c2_i32 : i32
    %1 = arith.addi %0, %arg1 : i32
    %c0_i32 = arith.constant 0 : i32
    %c0_i32_0 = arith.constant 0 : i32
    return %1, %c0_i32 : i32, i32
  }
  func.func @transform_1(%arg0: i32, %arg1: i32) -> (i32, i32) {
    %c0_i32 = arith.constant 0 : i32
    %c0_i32_0 = arith.constant 0 : i32
    %c0_i32_1 = arith.constant 0 : i32
    return %c0_i32, %c0_i32_0 : i32, i32
  }
  func.func @transform_2(%arg0: i32, %arg1: i32) -> (i32, i32) {
    %c0_i32 = arith.constant 0 : i32
    %c0_i32_0 = arith.constant 0 : i32
    %c0_i32_1 = arith.constant 0 : i32
    return %c0_i32, %c0_i32_0 : i32, i32
  }
  func.func @transform_3(%arg0: i32, %arg1: i32) -> (i32, i32) {
    %c0_i32 = arith.constant 0 : i32
    %c0_i32_0 = arith.constant 0 : i32
    %c0_i32_1 = arith.constant 0 : i32
    return %c0_i32, %c0_i32_0 : i32, i32
  }
  func.func @transform_4(%arg0: i32, %arg1: i32) -> (i32, i32) {
    %c2_i32 = arith.constant 2 : i32
    %0 = arith.muli %arg0, %c2_i32 : i32
    %1 = arith.addi %0, %arg1 : i32
    %c0_i32 = arith.constant 0 : i32
    %c0_i32_0 = arith.constant 0 : i32
    return %c0_i32, %1 : i32, i32
  }
  func.func @transform_5(%arg0: i32, %arg1: i32) -> (i32, i32, i32) {
    %c0_i32 = arith.constant 0 : i32
    %c0_i32_0 = arith.constant 0 : i32
    %c0_i32_1 = arith.constant 0 : i32
    return %arg0, %c0_i32, %c0_i32_0 : i32, i32, i32
  }
  func.func @transform_6(%arg0: i32, %arg1: i32) -> (i32, i32, i32) {
    %c0_i32 = arith.constant 0 : i32
    %c0_i32_0 = arith.constant 0 : i32
    %c0_i32_1 = arith.constant 0 : i32
    return %arg0, %c0_i32, %c0_i32_0 : i32, i32, i32
  }
  func.func @transform_7(%arg0: i32, %arg1: i32) -> (i32, i32, i32) {
    %c0_i32 = arith.constant 0 : i32
    %c0_i32_0 = arith.constant 0 : i32
    %c0_i32_1 = arith.constant 0 : i32
    return %arg0, %c0_i32, %c0_i32_0 : i32, i32, i32
  }
}

</mosaic_0001>

<bundles_post_ra>
// kernel: _bclassifier_forward_impl.1
= control target key start
LH: loop header
LB: loop body
LE: loop exit
PB: predicated region body
PF: predicated region fallthrough
CT: control target
= control target key end

     0   :  { %s1714_s24 = smov 0   ;;  %s1716_s25 = smov 0   ;;  %s2234_s0 = inlined_call_operand.vmem [shape: f32[256,128], index: 0, kind: input, shape index: {}]   ;;  %s2235_s1 = inlined_call_operand.vmem [shape: f32[128,256], index: 1, kind: input, shape index: {}]   ;;  %s2236_s2 = inlined_call_operand.vmem [shape: f32[1,256], index: 2, kind: input, shape index: {}]   ;;  %s2237_s3 = inlined_call_operand.vmem [shape: f32[4,128], index: 3, kind: input, shape index: {}]   ;;  %s2238_s4 = inlined_call_operand.vmem [shape: f32[4,256], index: 4, kind: output, shape index: {0}]   ;;  %s2239_s5 = inlined_call_operand.vmem [shape: f32[1,4,1], index: 5, kind: output, shape index: {1}]   ;;  %s2240_s6 = inlined_call_operand.vmem [shape: f32[1,4,1], index: 6, kind: output, shape index: {2}]   ;;  %s2241_s7 = inlined_call_operand.vmem [shape: f32[1,4,128], index: 7, kind: output, shape index: {3}]  }
   0x1   :  { %s1718_s26 = smov 0  }
   0x2 LB: > { %s27_s27 = sadd.s32 1, %s1655_s25  ;;  %p1250_p0 = scmp.ge.s32.totalorder %s1659_s26, 1  ;;  %s1659_s26 = sphi %s1718_s26, %s18_s26   ;;  %s1655_s25 = sphi %s1716_s25, %s2243_s25   ;;  %s1651_s24 = sphi %s1714_s24, %s2242_s24  }
   0x3   : > { %p28_p1 = scmp.ge.s32.totalorder %s27_s27, 2  ;;  %p269_p2 = scmp.lt.s32.totalorder %s1659_s26, 3 }
   0x5   : > { %s2245_s27 = smov (%p28_p1, %s27_s27), 0  ;;  %p270_p3 = pnand %p1250_p0, %p269_p2 }
   0x6   : > { %s1251_s28 = sshll.u32 (!%p270_p3), %s1651_s24, 4  ;;  %p328_p4 = scmp.lt.s32.totalorder (!%p270_p3), %s1651_s24, 1 }
   0x7   : > { %273 = sbr.rel (%p270_p3) target bundleno = 1733 (0x6c5), region = 36  ;;  %p319_p5 = scmp.lt.s32.totalorder (!%p270_p3), %s1251_s28, 31 }
   0x8   : > { %p1254_p6 = scmp.ne.s32.totalorder (!%p270_p3), %s1651_s24, 0 }
   0xe   : > { %s329_s29 = scalar_select %p328_p4, %s1651_s24, 1 }
   0xf   : > { %s2247_s28 = smov (!%p319_p5, %s1251_s28), 31  ;;  %349 = sbr.rel (%p1254_p6) target bundleno = 22 (0x16), region = 40 }
  0x10   : > { %s1253_s30 = sshll.u32 %s329_s29, 2  ;;  %s1252_s8 = sshll.u32 %s2247_s28, 3  ;;  %vm350_vm0 = vcmask (!%p1254_p6), 3072   ;;  %v1661_v0 = vmov (!%p1254_p6), -inf   ;;  %v1662_v1 = vmov (!%p1254_p6), 0.0  }
  0x11   : > { %s1740_s11 = scalar_lea.vmem %s2238_s4, %s1253_s30  ;;  %s1745_s14 = scalar_lea.vmem %s2234_s0, %s1252_s8  ;;  %351 = vst.msk [vmem:[#allocation2] sm:$0xf] (!%p1254_p6), %vm350_vm0, %v1661_v0  ;;  %352 = vst.msk [vmem:[#allocation3] sm:$0xf] (!%p1254_p6), %vm350_vm0, %v1662_v1 }
  0x12   : > { %353 = vst [vmem:[#allocation4] sm:$0xf] (!%p1254_p6), %v1662_v1 }
  0x16 PF: > { %v371_v2 = vld [vmem:[%s2235_s1 + $0x8] sm:$0xff]  ;;  %v373_v3 = vld [vmem:[%s2235_s1 + $0x18] sm:$0xff]  ;;  %v370_v4 = vld [vmem:[%s2235_s1] sm:$0xff]  ;;  %v1663_v9 = vmov 0.0   ;;  %vm1665_vm1 = vmmov 0   ;;  %s1255_s13 = sshll.u32 %s1651_s24, 7 }
  0x17   : > { %v1420_v5 = vpack.c.bf16 %v373_v3, %v371_v2  ;;  %v372_v6 = vld [vmem:[%s2235_s1 + $0x10] sm:$0xff]  ;;  %v375_v7 = vld [vmem:[%s2235_s1 + $0x28] sm:$0xff]  ;;  %v377_v8 = vld [vmem:[%s2235_s1 + $0x38] sm:$0xff]  ;;  %478 = vmatprep.mubr.f32.mxu0 %v1663_v9  ;;  %v404_v3 = vlaneseq  ;;  %1347 = vmatprep.mubr.msk.f32.mxu1 %vm1665_vm1, %v1663_v9  ;;  %s2161_s15 = sadd.s32 128, %s1255_s13 }
  0x18   : > { %v1422_v10 = vpack.c.bf16 %v372_v6, %v370_v4  ;;  %v1424_v11 = vpack.c.bf16 %v377_v8, %v375_v7  ;;  %v374_v12 = vld [vmem:[%s2235_s1 + $0x20] sm:$0xff]  ;;  %v376_v13 = vld [vmem:[%s2235_s1 + $0x30] sm:$0xff]  ;;  %v379_v14 = vld [vmem:[%s2235_s1 + $0x48] sm:$0xff]  ;;  %p1256_p7 = scmp.gt.s32.totalorder %s2161_s15, 200 }
  0x19   : > { %1421 = vmatprep.subr.bf16.mxu0 %v1420_v5  ;;  %v381_v15 = vld [vmem:[%s2235_s1 + $0x58] sm:$0xff]  ;;  %v1426_v16 = vpack.c.bf16 %v376_v13, %v374_v12  ;;  %v378_v18 = vld [vmem:[%s2235_s1 + $0x40] sm:$0xff]  ;;  %v380_v19 = vld [vmem:[%s2235_s1 + $0x50] sm:$0xff]  ;;  %v1877_v4 = vshrl.u32 %v404_v3, 7  ;;  %vm864_vm2 = vcmask (!%p1256_p7), 1043456   ;;  %vm886_vm3 = vcmask (!%p1256_p7), 3072  }
  0x1a   : > { %1423 = vmatpush1.bf16.msra.mxu0 %v1422_v10  ;;  %v1428_v17 = vpack.c.bf16 %v381_v15, %v379_v14  ;;  %v383_v20 = vld [vmem:[%s2235_s1 + $0x68] sm:$0xff]  ;;  %v385_v21 = vld [vmem:[%s2235_s1 + $0x78] sm:$0xff]  ;;  %v1430_v22 = vpack.c.bf16 %v380_v19, %v378_v18  ;;  %v382_v24 = vld [vmem:[%s2235_s1 + $0x60] sm:$0xff]  ;;  %vm1668_vm4 = vmmov (!%p1256_p7), 0  }
  0x1b   : > { %1425 = vmatprep.subr.bf16.mxu0 %v1424_v11  ;;  %v1432_v23 = vpack.c.bf16 %v385_v21, %v383_v20  ;;  %v384_v25 = vld [vmem:[%s2235_s1 + $0x70] sm:$0xff]  ;;  %v387_v26 = vld [vmem:[%s2235_s1 + $0x88] sm:$0xff]  ;;  %v389_v27 = vld [vmem:[%s2235_s1 + $0x98] sm:$0xff]  ;;  %v406_v5 = vsub.s32 0, %v1877_v4 }
  0x1c   : > { %v1434_v28 = vpack.c.bf16 %v384_v25, %v382_v24  ;;  %v1436_v29 = vpack.c.bf16 %v389_v27, %v387_v26  ;;  %v386_v30 = vld [vmem:[%s2235_s1 + $0x80] sm:$0xff]  ;;  %v388_v31 = vld [vmem:[%s2235_s1 + $0x90] sm:$0xff]  ;;  %v391_v32 = vld [vmem:[%s2235_s1 + $0xa8] sm:$0xff] }
  0x1d   : > { %v393_v33 = vld [vmem:[%s2235_s1 + $0xb8] sm:$0xff]  ;;  %v1438_v34 = vpack.c.bf16 %v388_v31, %v386_v30  ;;  %v390_v36 = vld [vmem:[%s2235_s1 + $0xa0] sm:$0xff]  ;;  %v392_v37 = vld [vmem:[%s2235_s1 + $0xb0] sm:$0xff] }
  0x1e   : > { %1427 = vmatpush1.bf16.msra.mxu0 %v1426_v16  ;;  %v1440_v35 = vpack.c.bf16 %v393_v33, %v391_v32  ;;  %v395_v38 = vld [vmem:[%s2235_s1 + $0xc8] sm:$0xff]  ;;  %v397_v39 = vld [vmem:[%s2235_s1 + $0xd8] sm:$0xff]  ;;  %v1442_v40 = vpack.c.bf16 %v392_v37, %v390_v36  ;;  %v394_v42 = vld [vmem:[%s2235_s1 + $0xc0] sm:$0xff] }
  0x1f   : > { %1429 = vmatprep.subr.bf16.mxu0 %v1428_v17  ;;  %v1444_v41 = vpack.c.bf16 %v397_v39, %v395_v38  ;;  %v396_v43 = vld [vmem:[%s2235_s1 + $0xd0] sm:$0xff]  ;;  %v399_v44 = vld [vmem:[%s2235_s1 + $0xe8] sm:$0xff]  ;;  %v401_v45 = vld [vmem:[%s2235_s1 + $0xf8] sm:$0xff] }
  0x20   : > { %v1446_v46 = vpack.c.bf16 %v396_v43, %v394_v42  ;;  %v1448_v47 = vpack.c.bf16 %v401_v45, %v399_v44  ;;  %v398_v48 = vld [vmem:[%s2235_s1 + $0xe0] sm:$0xff]  ;;  %v400_v49 = vld [vmem:[%s2235_s1 + $0xf0] sm:$0xff]  ;;  %v355_v52 = vld [vmem:[%s1745_s14 + $0x8] sm:$0xff] }
  0x21   : > { %v1450_v50 = vpack.c.bf16 %v400_v49, %v398_v48  ;;  %v354_v51 = vld [vmem:[%s1745_s14] sm:$0xff]  ;;  %v356_v53 = vld [vmem:[%s1745_s14 + $0x10] sm:$0xff]  ;;  %v357_v54 = vld [vmem:[%s1745_s14 + $0x18] sm:$0xff]  ;;  %v1664_v49 = vmov 0.0|0.0  }
  0x22   : > { %1431 = vmatpush1.bf16.msra.mxu0 %v1430_v22  ;;  %v358_v55 = vld [vmem:[%s1745_s14 + $0x20] sm:$0xff]  ;;  %v359_v56 = vld [vmem:[%s1745_s14 + $0x28] sm:$0xff]  ;;  %v360_v57 = vld [vmem:[%s1745_s14 + $0x30] sm:$0xff]  ;;  %1452 = vmatprep.subr.bf16.mxu1 %v1664_v49 }
  0x23   : > { %1433 = vmatprep.subr.bf16.mxu0 %v1432_v23  ;;  %v361_v58 = vld [vmem:[%s1745_s14 + $0x38] sm:$0xff]  ;;  %v362_v59 = vld [vmem:[%s1745_s14 + $0x40] sm:$0xff]  ;;  %v363_v60 = vld [vmem:[%s1745_s14 + $0x48] sm:$0xff] }
  0x24   : > { %v364_v61 = vld [vmem:[%s1745_s14 + $0x50] sm:$0xff]  ;;  %v365_v62 = vld [vmem:[%s1745_s14 + $0x58] sm:$0xff]  ;;  %v366_v63 = vld [vmem:[%s1745_s14 + $0x60] sm:$0xff] }
  0x25   : > { %v367_v0 = vld [vmem:[%s1745_s14 + $0x68] sm:$0xff]  ;;  %v368_v1 = vld [vmem:[%s1745_s14 + $0x70] sm:$0xff]  ;;  %v369_v2 = vld [vmem:[%s1745_s14 + $0x78] sm:$0xff] }
  0x26   : > { %1435 = vmatpush1.bf16.msra.mxu0 %v1434_v28  ;;  %v1883_v6 = vld [vmem:[%s2236_s2] sm:$0x3] }
  0x27   : > { %1437 = vmatprep.subr.bf16.mxu0 %v1436_v29  ;;  %v1886_v7 = vrot.slane %v1883_v6, %v406_v5 }
  0x2a   : > { %1439 = vmatpush1.bf16.msra.mxu0 %v1438_v34 }
  0x2b   : > { %1441 = vmatprep.subr.bf16.mxu0 %v1440_v35 }
  0x2e   : > { %1443 = vmatpush1.bf16.msra.mxu0 %v1442_v40 }
  0x2f   : > { %1445 = vmatprep.subr.bf16.mxu0 %v1444_v41 }
  0x32   : > { %1447 = vmatpush1.bf16.msra.mxu0 %v1446_v46 }
  0x33   : > { %1449 = vmatprep.subr.bf16.mxu0 %v1448_v47 }
  0x36   : > { %1451 = vmatpush1.bf16.msra.mxu0 %v1450_v50 }
  0x39   : > { %479 = vmatmul.mubr.f32.vlgmr.msra.gmra.mrb[0].mxu0 %v354_v51 }
  0x3a   : > { %484 = vmatprep.mubr.f32.mxu0 %v1663_v9 }
  0x3d   : > { %485 = vmatmul.mubr.f32.gmra.mrb[2].mxu0 %v355_v52 }
  0x3e   : > { %490 = vmatprep.mubr.f32.mxu0 %v1663_v9 }
  0x41   : > { %491 = vmatmul.mubr.f32.gmra.mrb[4].mxu0 %v356_v53 }
  0x42   : > { %496 = vmatprep.mubr.f32.mxu0 %v1663_v9 }
  0x45   : > { %497 = vmatmul.mubr.f32.gmra.mrb[6].mxu0 %v357_v54 }
  0x46   : > { %502 = vmatprep.mubr.f32.mxu0 %v1663_v9 }
  0x49   : > { %503 = vmatmul.mubr.f32.gmra.mrb[8].mxu0 %v358_v55 }
  0x4a   : > { %508 = vmatprep.mubr.f32.mxu0 %v1663_v9 }
  0x4d   : > { %509 = vmatmul.mubr.f32.gmra.mrb[10].mxu0 %v359_v56 }
  0x4e   : > { %514 = vmatprep.mubr.f32.mxu0 %v1663_v9 }
  0x51   : > { %515 = vmatmul.mubr.f32.gmra.mrb[12].mxu0 %v360_v57  ;;  %v410_v57 = vsub.s32 1, %v1877_v4 }
  0x52   : > { %520 = vmatprep.mubr.f32.mxu0 %v1663_v9 }
  0x55   : > { %521 = vmatmul.mubr.f32.gmra.mrb[14].mxu0 %v361_v58 }
  0x56   : > { %526 = vmatprep.mubr.f32.mxu0 %v1663_v9 }
  0x59   : > { %527 = vmatmul.mubr.f32.gmra.mrb[16].mxu0 %v362_v59 }
  0x5a   : > { %532 = vmatprep.mubr.f32.mxu0 %v1663_v9 }
  0x5d   : > { %533 = vmatmul.mubr.f32.gmra.mrb[18].mxu0 %v363_v60 }
  0x5e   : > { %538 = vmatprep.mubr.f32.mxu0 %v1663_v9 }
  0x61   : > { %539 = vmatmul.mubr.f32.gmra.mrb[20].mxu0 %v364_v61 }
  0x62   : > { %544 = vmatprep.mubr.f32.mxu0 %v1663_v9 }
  0x65   : > { %545 = vmatmul.mubr.f32.gmra.mrb[22].mxu0 %v365_v62  ;;  %v1974_v62 = vrot.slane %v1883_v6, %v410_v57 }
  0x66   : > { %550 = vmatprep.mubr.f32.mxu0 %v1663_v9 }
  0x69   : > { %551 = vmatmul.mubr.f32.gmra.mrb[24].mxu0 %v366_v63 }
  0x6a   : > { %556 = vmatprep.mubr.f32.mxu0 %v1663_v9 }
  0x6d   : > { %557 = vmatmul.mubr.f32.gmra.mrb[26].mxu0 %v367_v0 }
  0x6e   : > { %562 = vmatprep.mubr.f32.mxu0 %v1663_v9 }
  0x71   : > { %563 = vmatmul.mubr.f32.gmra.mrb[28].mxu0 %v368_v1 }
  0x72   : > { %568 = vmatprep.mubr.f32.mxu0 %v1663_v9 }
  0x75   : > { %569 = vmatmul.mubr.f32.gmra.mrb[30].mxu0 %v369_v2 }
 0x10c   : > { %v480_v8 = vpop.f32.mrb[0].mxu0 }
 0x10d   : > { %v1889_v10 = vadd.f32 %v480_v8, %v1886_v7  ;;  %v1891_v11 = vpop.f32.mrb[1].mxu0 }
 0x10e   : > { %v483_v4 = vadd.f32 %v1891_v11, %v1974_v62 }
 0x10f   : > { %v575_v12 = vmul.f32 %v1889_v10, %v1889_v10 }
 0x110   : > { %v486_v13 = vpop.f32.mrb[2].mxu0 }
 0x111   : > { %v1896_v14 = vadd.f32 %v486_v13, %v1886_v7  ;;  %v1898_v15 = vpop.f32.mrb[3].mxu0  ;;  %591 = vadd.xlane.f32.xlu0 %v575_v12  ;;  %v1988_v13 = vmax.f32 %v483_v4, 0.0 }
 0x113   : > { %v576_v16 = vmul.f32 %v1896_v14, %v1896_v14 }
 0x114   : > { %v492_v17 = vpop.f32.mrb[4].mxu0 }
 0x115   : > { %v1903_v18 = vadd.f32 %v492_v17, %v1886_v7  ;;  %v1905_v19 = vpop.f32.mrb[5].mxu0  ;;  %593 = vadd.xlane.f32.xlu0 %v576_v16  ;;  %v489_v16 = vadd.f32 %v1898_v15, %v1974_v62 }
 0x116   : > { %v495_v17 = vadd.f32 %v1905_v19, %v1974_v62 }
 0x117   : > { %v577_v20 = vmul.f32 %v1903_v18, %v1903_v18 }
 0x118   : > { %v498_v21 = vpop.f32.mrb[6].mxu0  ;;  %v2005_v15 = vmax.f32 %v495_v17, 0.0 }
 0x119   : > { %v1910_v22 = vadd.f32 %v498_v21, %v1886_v7  ;;  %v1912_v23 = vpop.f32.mrb[7].mxu0  ;;  %595 = vadd.xlane.f32.xlu1 %v577_v20 }
 0x11b   : > { %v578_v24 = vmul.f32 %v1910_v22, %v1910_v22 }
 0x11c   : > { %v504_v25 = vpop.f32.mrb[8].mxu0 }
 0x11d   : > { %v1917_v26 = vadd.f32 %v504_v25, %v1886_v7  ;;  %v1919_v27 = vpop.f32.mrb[9].mxu0  ;;  %597 = vadd.xlane.f32.xlu1 %v578_v24  ;;  %v501_v25 = vadd.f32 %v1912_v23, %v1974_v62 }
 0x11e   : > { %v507_v19 = vadd.f32 %v1919_v27, %v1974_v62  ;;  %v689_v27 = vmul.f32 %v2005_v15, %v2005_v15 }
 0x11f   : > { %v579_v28 = vmul.f32 %v1917_v26, %v1917_v26 }
 0x120   : > { %v510_v29 = vpop.f32.mrb[10].mxu0 }
 0x121   : > { %v1924_v30 = vadd.f32 %v510_v29, %v1886_v7  ;;  %v1926_v31 = vpop.f32.mrb[11].mxu0  ;;  %599 = vadd.xlane.f32.xlu0 %v579_v28  ;;  %v687_v28 = vmul.f32 %v1988_v13, %v1988_v13  ;;  %v2003_v29 = vmax.f32 %v489_v16, 0.0 }
 0x122   : > { %v513_v23 = vadd.f32 %v1926_v31, %v1974_v62 }
 0x123   : > { %v580_v32 = vmul.f32 %v1924_v30, %v1924_v30 }
 0x124   : > { %v516_v33 = vpop.f32.mrb[12].mxu0 }
 0x125   : > { %v1931_v34 = vadd.f32 %v516_v33, %v1886_v7  ;;  %v1933_v35 = vpop.f32.mrb[13].mxu0  ;;  %601 = vadd.xlane.f32.xlu1 %v580_v32  ;;  %v2015_v33 = vmax.f32 %v507_v19, 0.0 }
 0x127   : > { %v581_v36 = vmul.f32 %v1931_v34, %v1931_v34 }
 0x128   : > { %v522_v37 = vpop.f32.mrb[14].mxu0 }
 0x129   : > { %v1938_v38 = vadd.f32 %v522_v37, %v1886_v7  ;;  %v1940_v39 = vpop.f32.mrb[15].mxu0  ;;  %603 = vadd.xlane.f32.xlu0 %v581_v36  ;;  %v519_v36 = vadd.f32 %v1933_v35, %v1974_v62  ;;  %v688_v37 = vmul.f32 %v2003_v29, %v2003_v29 }
 0x12a   : > { %v525_v31 = vadd.f32 %v1940_v39, %v1974_v62 }
 0x12b   : > { %v582_v40 = vmul.f32 %v1938_v38, %v1938_v38 }
 0x12c   : > { %v528_v41 = vpop.f32.mrb[16].mxu0 }
 0x12d   : > { %v1945_v42 = vadd.f32 %v528_v41, %v1886_v7  ;;  %v1947_v43 = vpop.f32.mrb[17].mxu0  ;;  %605 = vadd.xlane.f32.xlu1 %v582_v40  ;;  %v2023_v40 = vmax.f32 %v513_v23, 0.0 }
 0x12e   : > { %v531_v35 = vadd.f32 %v1947_v43, %v1974_v62 }
 0x12f   : > { %v583_v44 = vmul.f32 %v1945_v42, %v1945_v42 }
 0x130   : > { %v534_v45 = vpop.f32.mrb[18].mxu0 }
 0x131   : > { %v1952_v46 = vadd.f32 %v534_v45, %v1886_v7  ;;  %v1954_v47 = vpop.f32.mrb[19].mxu0  ;;  %607 = vadd.xlane.f32.xlu0 %v583_v44  ;;  %v2027_v44 = vmax.f32 %v519_v36, 0.0  ;;  %v691_v45 = vmul.f32 %v2015_v33, %v2015_v33 }
 0x133   : > { %v584_v48 = vmul.f32 %v1952_v46, %v1952_v46  ;;  %v693_v43 = vmul.f32 %v2027_v44, %v2027_v44 }
 0x134   : > { %v540_v50 = vpop.f32.mrb[20].mxu0 }
 0x135   : > { %v1960_v51 = vadd.f32 %v540_v50, %v1886_v7  ;;  %v542_v52 = vpop.f32.mrb[21].mxu0  ;;  %609 = vadd.xlane.f32.xlu1 %v584_v48  ;;  %v537_v48 = vadd.f32 %v1954_v47, %v1974_v62  ;;  %v692_v50 = vmul.f32 %v2023_v40, %v2023_v40 }
 0x136   : > { %v543_v39 = vadd.f32 %v542_v52, %v1974_v62 }
 0x137   : > { %v585_v53 = vmul.f32 %v1960_v51, %v1960_v51  ;;  %v2046_v57 = vmax.f32 %v537_v48, 0.0 }
 0x138   : > { %v546_v54 = vpop.f32.mrb[22].mxu0 }
 0x139   : > { %v1965_v55 = vadd.f32 %v546_v54, %v1886_v7  ;;  %v548_v56 = vpop.f32.mrb[23].mxu0  ;;  %611 = vadd.xlane.f32.xlu0 %v585_v53  ;;  %v2039_v53 = vmax.f32 %v525_v31, 0.0  ;;  %v2041_v54 = vmax.f32 %v531_v35, 0.0  ;;  %v696_v4 = vmul.f32 %v2046_v57, %v2046_v57 }
 0x13b   : > { %v586_v58 = vmul.f32 %v1965_v55, %v1965_v55 }
 0x13c   : > { %v552_v59 = vpop.f32.mrb[24].mxu0 }
 0x13d   : > { %v1971_v60 = vadd.f32 %v552_v59, %v1886_v7  ;;  %v554_v61 = vpop.f32.mrb[25].mxu0  ;;  %613 = vadd.xlane.f32.xlu1 %v586_v58  ;;  %v549_v58 = vadd.f32 %v548_v56, %v1974_v62  ;;  %v2049_v59 = vmax.f32 %v543_v39, 0.0 }
 0x13e   : > { %v555_v47 = vadd.f32 %v554_v61, %v1974_v62 }
 0x13f   : > { %v587_v63 = vmul.f32 %v1971_v60, %v1971_v60  ;;  %v2056_v52 = vmax.f32 %v549_v58, 0.0  ;;  %v697_v61 = vmul.f32 %v2049_v59, %v2049_v59 }
 0x140   : > { %v558_v0 = vpop.f32.mrb[26].mxu0 }
 0x141   : > { %v1979_v1 = vadd.f32 %v558_v0, %v1886_v7  ;;  %v560_v2 = vpop.f32.mrb[27].mxu0  ;;  %615 = vadd.xlane.f32.xlu0 %v587_v63  ;;  %v694_v63 = vmul.f32 %v2039_v53, %v2039_v53  ;;  %v695_v0 = vmul.f32 %v2041_v54, %v2041_v54  ;;  %v698_v16 = vmul.f32 %v2056_v52, %v2056_v52 }
 0x142   : > { %v561_v56 = vadd.f32 %v560_v2, %v1974_v62 }
 0x143   : > { %v588_v5 = vmul.f32 %v1979_v1, %v1979_v1 }
 0x144   : > { %v564_v8 = vpop.f32.mrb[28].mxu0  ;;  %v2068_v17 = vmax.f32 %v561_v56, 0.0 }
 0x145   : > { %v1986_v12 = vadd.f32 %v564_v8, %v1886_v7  ;;  %v566_v6 = vpop.f32.mrb[29].mxu0  ;;  %617 = vadd.xlane.f32.xlu1 %v588_v5  ;;  %v2060_v5 = vmax.f32 %v555_v47, 0.0 }
 0x146   : > { %v567_v8 = vadd.f32 %v566_v6, %v1974_v62  ;;  %v700_v6 = vmul.f32 %v2068_v17, %v2068_v17 }
 0x147   : > { %v589_v11 = vmul.f32 %v1986_v12, %v1986_v12 }
 0x148   : > { %v570_v20 = vpop.f32.mrb[30].mxu0 }
 0x149   : > { %v1997_v21 = vadd.f32 %v570_v20, %v1886_v7  ;;  %v572_v24 = vpop.f32.mrb[31].mxu0  ;;  %619 = vadd.xlane.f32.xlu0 %v589_v11  ;;  %v2011_v7 = vmax.f32 %v501_v25, 0.0  ;;  %v2070_v11 = vmax.f32 %v567_v8, 0.0  ;;  %v699_v25 = vmul.f32 %v2060_v5, %v2060_v5 }
 0x14a   : > { %v573_v20 = vadd.f32 %v572_v24, %v1974_v62 }
 0x14b   : > { %v590_v32 = vmul.f32 %v1997_v21, %v1997_v21  ;;  %v690_v41 = vmul.f32 %v2011_v7, %v2011_v7 }
 0x14c   : > { %v2075_v2 = vmax.f32 %v573_v20, 0.0 }
 0x14d   : > { %621 = vadd.xlane.f32.xlu1 %v590_v32  ;;  %703 = vadd.xlane.f32.xlu0 %v687_v28  ;;  %v701_v28 = vmul.f32 %v2070_v11, %v2070_v11 }
 0x14e   : > { %v702_v19 = vmul.f32 %v2075_v2, %v2075_v2 }
 0x151   : > { %705 = vadd.xlane.f32.xlu1 %v688_v37  ;;  %707 = vadd.xlane.f32.xlu0 %v689_v27 }
 0x155   : > { %709 = vadd.xlane.f32.xlu1 %v690_v41  ;;  %711 = vadd.xlane.f32.xlu0 %v691_v45 }
 0x159   : > { %713 = vadd.xlane.f32.xlu1 %v692_v50  ;;  %715 = vadd.xlane.f32.xlu0 %v693_v43 }
 0x15d   : > { %717 = vadd.xlane.f32.xlu1 %v694_v63  ;;  %719 = vadd.xlane.f32.xlu0 %v695_v0 }
 0x161   : > { %721 = vadd.xlane.f32.xlu1 %v696_v4  ;;  %723 = vadd.xlane.f32.xlu0 %v697_v61 }
 0x165   : > { %725 = vadd.xlane.f32.xlu1 %v698_v16  ;;  %727 = vadd.xlane.f32.xlu0 %v699_v25 }
 0x169   : > { %729 = vadd.xlane.f32.xlu1 %v700_v6  ;;  %731 = vadd.xlane.f32.xlu0 %v701_v28 }
 0x16d   : > { %733 = vadd.xlane.f32.xlu1 %v702_v19 }
 0x19e   : > { %v592_v62 = vpop.xlane.xlu0 %591 }
 0x19f   : > { %v623_v24 = vmax.f32 %v592_v62, 1e-24 }
 0x1a1   : > { %1561 = vrsqrt.f32 %v623_v24 }
 0x1a2   : > { %v594_v32 = vpop.xlane.xlu0 %593 }
 0x1a3   : > { %v624_v23 = vmax.f32 %v594_v32, 1e-24 }
 0x1a5   : > { %1563 = vrsqrt.f32 %v624_v23 }
 0x1a6   : > { %v596_v36 = vpop.xlane.xlu1 %595 }
 0x1a7   : > { %v625_v37 = vmax.f32 %v596_v36, 1e-24 }
 0x1a9   : > { %1565 = vrsqrt.f32 %v625_v37 }
 0x1aa   : > { %v598_v27 = vpop.xlane.xlu1 %597 }
 0x1ab   : > { %v626_v41 = vmax.f32 %v598_v27, 1e-24  ;;  %v1562_v31 = vpop.eup %1561 }
 0x1ac   : > { %v655_v50 = vmul.f32 %v1562_v31, %v1889_v10 }
 0x1ad   : > { %1567 = vrsqrt.f32 %v626_v41 }
 0x1ae   : > { %v600_v35 = vpop.xlane.xlu0 %599 }
 0x1af   : > { %v1564_v45 = vpop.eup %1563  ;;  %v627_v48 = vmax.f32 %v600_v35, 1e-24 }
 0x1b0   : > { %v656_v9 = vmul.f32 %v1564_v45, %v1896_v14 }
 0x1b1   : > { %1569 = vrsqrt.f32 %v627_v48 }
 0x1b2   : > { %v602_v39 = vpop.xlane.xlu1 %601  ;;  %v1453_v43 = vpack.c.bf16 %v656_v9, %v655_v50 }
 0x1b3   : > { %v628_v58 = vmax.f32 %v602_v39, 1e-24  ;;  %v1566_v47 = vpop.eup %1565 }
 0x1b4   : > { %1454 = vmatpush3.bf16.xpose.msra.mxu1 %v1453_v43  ;;  %v657_v56 = vmul.f32 %v1566_v47, %v1903_v18 }
 0x1b5   : > { %1571 = vrsqrt.f32 %v628_v58  ;;  %1455 = vmatprep.subr.bf16.mxu1 %v1664_v49 }
 0x1b6   : > { %v604_v63 = vpop.xlane.xlu0 %603 }
 0x1b7   : > { %v1568_v0 = vpop.eup %1567  ;;  %v629_v4 = vmax.f32 %v604_v63, 1e-24 }
 0x1b8   : > { %v658_v8 = vmul.f32 %v1568_v0, %v1910_v22 }
 0x1b9   : > { %1573 = vrsqrt.f32 %v629_v4 }
 0x1ba   : > { %v606_v61 = vpop.xlane.xlu1 %605  ;;  %v1456_v10 = vpack.c.bf16 %v658_v8, %v657_v56 }
 0x1bb   : > { %v630_v14 = vmax.f32 %v606_v61, 1e-24  ;;  %v1570_v16 = vpop.eup %1569 }
 0x1bc   : > { %1457 = vmatpush3.bf16.xpose.msra.mxu1 %v1456_v10  ;;  %v659_v28 = vmul.f32 %v1570_v16, %v1917_v26 }
 0x1bd   : > { %1575 = vrsqrt.f32 %v630_v14  ;;  %1458 = vmatprep.subr.bf16.mxu1 %v1664_v49 }
 0x1be   : > { %v608_v20 = vpop.xlane.xlu0 %607 }
 0x1bf   : > { %v1572_v25 = vpop.eup %1571  ;;  %v631_v6 = vmax.f32 %v608_v20, 1e-24 }
 0x1c0   : > { %v660_v19 = vmul.f32 %v1572_v25, %v1924_v30 }
 0x1c1   : > { %1577 = vrsqrt.f32 %v631_v6 }
 0x1c2   : > { %v610_v62 = vpop.xlane.xlu1 %609  ;;  %v1459_v18 = vpack.c.bf16 %v660_v19, %v659_v28 }
 0x1c3   : > { %v632_v22 = vmax.f32 %v610_v62, 1e-24  ;;  %v1574_v24 = vpop.eup %1573 }
 0x1c4   : > { %1460 = vmatpush3.bf16.xpose.msra.mxu1 %v1459_v18  ;;  %v661_v37 = vmul.f32 %v1574_v24, %v1931_v34 }
 0x1c5   : > { %1579 = vrsqrt.f32 %v632_v22  ;;  %1461 = vmatprep.subr.bf16.mxu1 %v1664_v49 }
 0x1c6   : > { %v612_v32 = vpop.xlane.xlu0 %611 }
 0x1c7   : > { %v1576_v23 = vpop.eup %1575  ;;  %v633_v36 = vmax.f32 %v612_v32, 1e-24 }
 0x1c8   : > { %v662_v27 = vmul.f32 %v1576_v23, %v1938_v38 }
 0x1c9   : > { %1581 = vrsqrt.f32 %v633_v36 }
 0x1ca   : > { %v614_v41 = vpop.xlane.xlu1 %613  ;;  %v1462_v26 = vpack.c.bf16 %v662_v27, %v661_v37 }
 0x1cb   : > { %v634_v30 = vmax.f32 %v614_v41, 1e-24  ;;  %v1578_v31 = vpop.eup %1577 }
 0x1cc   : > { %1463 = vmatpush3.bf16.xpose.msra.mxu1 %v1462_v26  ;;  %v663_v50 = vmul.f32 %v1578_v31, %v1945_v42 }
 0x1cd   : > { %1583 = vrsqrt.f32 %v634_v30  ;;  %1464 = vmatprep.subr.bf16.mxu1 %v1664_v49 }
 0x1ce   : > { %v616_v35 = vpop.xlane.xlu0 %615 }
 0x1cf   : > { %v1580_v45 = vpop.eup %1579  ;;  %v635_v48 = vmax.f32 %v616_v35, 1e-24 }
 0x1d0   : > { %v664_v9 = vmul.f32 %v1580_v45, %v1952_v46 }
 0x1d1   : > { %1585 = vrsqrt.f32 %v635_v48 }
 0x1d2   : > { %v618_v39 = vpop.xlane.xlu1 %617  ;;  %v1465_v34 = vpack.c.bf16 %v664_v9, %v663_v50 }
 0x1d3   : > { %v636_v38 = vmax.f32 %v618_v39, 1e-24  ;;  %v1582_v43 = vpop.eup %1581 }
 0x1d4   : > { %1466 = vmatpush3.bf16.xpose.msra.mxu1 %v1465_v34  ;;  %v665_v0 = vmul.f32 %v1582_v43, %v1960_v51 }
 0x1d5   : > { %1587 = vrsqrt.f32 %v636_v38  ;;  %1467 = vmatprep.subr.bf16.mxu1 %v1664_v49 }
 0x1d6   : > { %v620_v58 = vpop.xlane.xlu0 %619 }
 0x1d7   : > { %v1584_v47 = vpop.eup %1583  ;;  %v637_v63 = vmax.f32 %v620_v58, 1e-24 }
 0x1d8   : > { %v666_v4 = vmul.f32 %v1584_v47, %v1965_v55 }
 0x1d9   : > { %1589 = vrsqrt.f32 %v637_v63 }
 0x1da   : > { %v622_v56 = vpop.xlane.xlu1 %621  ;;  %v704_v42 = vpop.xlane.xlu0 %703  ;;  %v1468_v8 = vpack.c.bf16 %v666_v4, %v665_v0 }
 0x1db   : > { %v638_v46 = vmax.f32 %v622_v56, 1e-24  ;;  %v735_v61 = vmax.f32 %v704_v42, 1e-24  ;;  %v1586_v10 = vpop.eup %1585 }
 0x1dc   : > { %1469 = vmatpush3.bf16.xpose.msra.mxu1 %v1468_v8  ;;  %v667_v51 = vmul.f32 %v1586_v10, %v1971_v60 }
 0x1dd   : > { %1591 = vrsqrt.f32 %v638_v46  ;;  %1470 = vmatprep.subr.bf16.mxu1 %v1664_v49 }
 0x1de   : > { %1593 = vrsqrt.f32 %v735_v61  ;;  %v706_v14 = vpop.xlane.xlu1 %705  ;;  %v708_v16 = vpop.xlane.xlu0 %707 }
 0x1df   : > { %v1588_v20 = vpop.eup %1587  ;;  %v736_v25 = vmax.f32 %v706_v14, 1e-24  ;;  %v737_v6 = vmax.f32 %v708_v16, 1e-24 }
 0x1e0   : > { %v668_v55 = vmul.f32 %v1588_v20, %v1979_v1 }
 0x1e1   : > { %1595 = vrsqrt.f32 %v736_v25 }
 0x1e2   : > { %1597 = vrsqrt.f32 %v737_v6  ;;  %v710_v28 = vpop.xlane.xlu1 %709  ;;  %v712_v19 = vpop.xlane.xlu0 %711  ;;  %v1471_v62 = vpack.c.bf16 %v668_v55, %v667_v51 }
 0x1e3   : > { %v738_v18 = vmax.f32 %v710_v28, 1e-24  ;;  %v739_v22 = vmax.f32 %v712_v19, 1e-24  ;;  %v1590_v24 = vpop.eup %1589 }
 0x1e4   : > { %1472 = vmatpush3.bf16.xpose.msra.mxu1 %v1471_v62  ;;  %v669_v1 = vmul.f32 %v1590_v24, %v1986_v12 }
 0x1e5   : > { %1599 = vrsqrt.f32 %v738_v18  ;;  %1473 = vmatprep.subr.bf16.mxu1 %v1664_v49 }
 0x1e6   : > { %1601 = vrsqrt.f32 %v739_v22  ;;  %v714_v32 = vpop.xlane.xlu1 %713  ;;  %v716_v23 = vpop.xlane.xlu0 %715 }
 0x1e7   : > { %v1592_v36 = vpop.eup %1591  ;;  %v740_v37 = vmax.f32 %v714_v32, 1e-24  ;;  %v741_v60 = vmax.f32 %v716_v23, 1e-24  ;;  %v1667_v23 = vmov (!%p1256_p7), 0.0|0.0  }
 0x1e8   : > { %v1594_v27 = vpop.eup %1593  ;;  %v670_v41 = vmul.f32 %v1592_v36, %v1997_v21  ;;  %1476 = vmatprep.subr.bf16.mxu0 (!%p1256_p7), %v1667_v23 }
 0x1e9   : > { %v2108_v26 = vmul.f32 %v1594_v27, %v1988_v13  ;;  %1603 = vrsqrt.f32 %v740_v37  ;;  %v863_v27 = vld [vmem:[#allocation2] sm:$0xf] (!%p1256_p7) }
 0x1ea   : > { %1605 = vrsqrt.f32 %v741_v60  ;;  %v718_v30 = vpop.xlane.xlu1 %717  ;;  %v720_v31 = vpop.xlane.xlu0 %719  ;;  %v1474_v35 = vpack.c.bf16 %v670_v41, %v669_v1 }
 0x1eb   : > { %v1596_v49 = vpop.eup %1595  ;;  %v742_v45 = vmax.f32 %v718_v30, 1e-24  ;;  %v743_v48 = vmax.f32 %v720_v31, 1e-24 }
 0x1ec   : > { %v1598_v50 = vpop.eup %1597  ;;  %v2111_v9 = vmul.f32 %v1596_v49, %v2003_v29  ;;  %1475 = vmatpush3.bf16.xpose.msra.mxu1 %v1474_v35  ;;  %v783_v29 = vld [vmem:[%s2237_s3] sm:$0xf] }
 0x1ed   : > { %v2114_v12 = vmul.f32 %v1598_v50, %v2005_v15  ;;  %1607 = vrsqrt.f32 %v742_v45  ;;  %v1669_v45 = vmov (!%p1256_p7), 0.0  }
 0x1ee   : > { %1609 = vrsqrt.f32 %v743_v48  ;;  %v722_v13 = vpop.xlane.xlu1 %721  ;;  %v724_v21 = vpop.xlane.xlu0 %723  ;;  %1382 = vmatprep.mubr.msk.f32.mxu0 (!%p1256_p7), %vm1668_vm4, %v1669_v45 }
 0x1ef   : > { %v1600_v39 = vpop.eup %1599  ;;  %v744_v34 = vmax.f32 %v722_v13, 1e-24  ;;  %v745_v38 = vmax.f32 %v724_v21, 1e-24 }
 0x1f0   : > { %v1602_v43 = vpop.eup %1601  ;;  %v2117_v58 = vmul.f32 %v1600_v39, %v2011_v7 }
 0x1f1   : > { %v2123_v47 = vmul.f32 %v1602_v43, %v2015_v33  ;;  %1611 = vrsqrt.f32 %v744_v34 }
 0x1f2   : > { %1613 = vrsqrt.f32 %v745_v38  ;;  %v726_v15 = vpop.xlane.xlu1 %725  ;;  %v728_v63 = vpop.xlane.xlu0 %727  ;;  %v1480_v36 = vpack.c.bf16 (!%p1256_p7), %v2117_v58, %v2114_v12 }
 0x1f3   : > { %v1604_v0 = vpop.eup %1603  ;;  %v746_v4 = vmax.f32 %v726_v15, 1e-24  ;;  %v747_v56 = vmax.f32 %v728_v63, 1e-24  ;;  %1348 = vmatmul.mubr.f32.vlgmr.msra.gmra.mrb[0].mxu1 %v783_v29  ;;  %v880_v29 = vld [vmem:[#allocation3] sm:$0xf] (!%p1256_p7) }
 0x1f4   : > { %v1606_v42 = vpop.eup %1605  ;;  %v2126_v8 = vmul.f32 %v1604_v0, %v2023_v40 }
 0x1f5   : > { %v2129_v7 = vmul.f32 %v1606_v42, %v2027_v44  ;;  %1615 = vrsqrt.f32 %v746_v4  ;;  %v888_v4 = vld [vmem:[#allocation4] sm:$0xf] (!%p1256_p7) }
 0x1f6   : > { %1617 = vrsqrt.f32 %v747_v56  ;;  %v730_v46 = vpop.xlane.xlu1 %729  ;;  %v732_v33 = vpop.xlane.xlu0 %731  ;;  %v1483_v37 = vpack.c.bf16 (!%p1256_p7), %v2126_v8, %v2123_v47 }
 0x1f7   : > { %v1608_v61 = vpop.eup %1607  ;;  %v748_v10 = vmax.f32 %v730_v46, 1e-24  ;;  %v749_v14 = vmax.f32 %v732_v33, 1e-24 }
 0x1f8   : > { %v1610_v16 = vpop.eup %1609  ;;  %v2132_v20 = vmul.f32 %v1608_v61, %v2039_v53 }
 0x1f9   : > { %v2135_v25 = vmul.f32 %v1610_v16, %v2041_v54  ;;  %1619 = vrsqrt.f32 %v748_v10 }
 0x1fa   : > { %1621 = vrsqrt.f32 %v749_v14  ;;  %v734_v40 = vpop.xlane.xlu1 %733  ;;  %v1486_v60 = vpack.c.bf16 (!%p1256_p7), %v2132_v20, %v2129_v7 }
 0x1fb   : > { %v1612_v6 = vpop.eup %1611  ;;  %v750_v44 = vmax.f32 %v734_v40, 1e-24 }
 0x1fc   : > { %v1614_v51 = vpop.eup %1613  ;;  %v2138_v55 = vmul.f32 %v1612_v6, %v2046_v57 }
 0x1fd   : > { %v2141_v28 = vmul.f32 %v1614_v51, %v2049_v59  ;;  %1623 = vrsqrt.f32 %v750_v44 }
 0x1fe   : > { %v1489_v30 = vpack.c.bf16 (!%p1256_p7), %v2138_v55, %v2135_v25 }
 0x1ff   : > { %v1616_v53 = vpop.eup %1615 }
 0x200   : > { %v1618_v19 = vpop.eup %1617  ;;  %v2144_v54 = vmul.f32 %v1616_v53, %v2056_v52 }
 0x201   : > { %v2147_v62 = vmul.f32 %v1618_v19, %v2060_v5 }
 0x202   : > { %v1492_v35 = vpack.c.bf16 (!%p1256_p7), %v2144_v54, %v2141_v28 }
 0x203   : > { %v1620_v18 = vpop.eup %1619 }
 0x204   : > { %v1622_v22 = vpop.eup %1621  ;;  %v2150_v24 = vmul.f32 %v1620_v18, %v2068_v17 }
 0x205   : > { %v2153_v57 = vmul.f32 %v1622_v22, %v2070_v11  ;;  %v1666_v11 = vmov (!%p1256_p7), 0  }
 0x206   : > { %1625 = vset.pattern.permute.xlu0 (!%p1256_p7), %v1666_v11  ;;  %1626 = vset.pattern.permute.xlu1 (!%p1256_p7), %v1666_v11  ;;  %v1495_v49 = vpack.c.bf16 (!%p1256_p7), %v2150_v24, %v2147_v62 }
 0x207   : > { %v1624_v32 = vpop.eup %1623 }
 0x208   : > { %v2156_v59 = vmul.f32 %v1624_v32, %v2075_v2  ;;  %v1477_v2 = vpack.c.bf16 (!%p1256_p7), %v2111_v9, %v2108_v26 }
 0x20a   : > { %1478 = vmatpush3.bf16.msra.mxu0 (!%p1256_p7), %v1477_v2  ;;  %v1498_v48 = vpack.c.bf16 (!%p1256_p7), %v2156_v59, %v2153_v57 }
 0x20b   : > { %1479 = vmatprep.subr.bf16.mxu0 (!%p1256_p7), %v1667_v23 }
 0x20e   : > { %1481 = vmatpush3.bf16.msra.mxu0 (!%p1256_p7), %v1480_v36 }
 0x20f   : > { %1482 = vmatprep.subr.bf16.mxu0 (!%p1256_p7), %v1667_v23 }
 0x212   : > { %1484 = vmatpush3.bf16.msra.mxu0 (!%p1256_p7), %v1483_v37 }
 0x213   : > { %1485 = vmatprep.subr.bf16.mxu0 (!%p1256_p7), %v1667_v23 }
 0x216   : > { %1487 = vmatpush3.bf16.msra.mxu0 (!%p1256_p7), %v1486_v60 }
 0x217   : > { %1488 = vmatprep.subr.bf16.mxu0 (!%p1256_p7), %v1667_v23 }
 0x21a   : > { %1490 = vmatpush3.bf16.msra.mxu0 (!%p1256_p7), %v1489_v30 }
 0x21b   : > { %1491 = vmatprep.subr.bf16.mxu0 (!%p1256_p7), %v1667_v23 }
 0x21e   : > { %1493 = vmatpush3.bf16.msra.mxu0 (!%p1256_p7), %v1492_v35 }
 0x21f   : > { %1494 = vmatprep.subr.bf16.mxu0 (!%p1256_p7), %v1667_v23 }
 0x222   : > { %1496 = vmatpush3.bf16.msra.mxu0 (!%p1256_p7), %v1495_v49 }
 0x223   : > { %1497 = vmatprep.subr.bf16.mxu0 (!%p1256_p7), %v1667_v23 }
 0x226   : > { %1499 = vmatpush3.bf16.msra.mxu0 (!%p1256_p7), %v1498_v48 }
 0x2c1   : > { %862 = sbr.rel (%p1256_p7) target bundleno = 1214 (0x4be), region = 44 }
 0x2c6   : > { %v2163_v52 = vpop.f32.mrb[0].mxu1 }
 0x2c7   : > { %854 = vst [vmem:[%s1740_s11] sm:$0xf] %v2163_v52  ;;  %v1349_v5 = vpop.f32.mrb[1].mxu1  ;;  %v865_v17 = vsel (!%p1256_p7), %vm864_vm2, %v2163_v52, -inf }
 0x2c8   : > { %866 = vmax.xlane.f32.xlu0 %v865_v17 }
 0x355   : > { %v867_v1 = vpop.xlane.xlu0 %866 }
 0x356   : > { %v868_v41 = vmax.f32 %v863_v27, %v867_v1 }
 0x358   : > { %v869_v31 = vsub.f32 %v863_v27, %v868_v41  ;;  %967 = vst.msk [vmem:[#allocation2] sm:$0xf] %vm886_vm3, %v868_v41  ;;  %874 = vperm.xlu0 %1625, %v868_v41  }
 0x35a   : > { %v870_v38 = vmul.f32 1.442695, %v869_v31 }
 0x3d7   : > { %v875_v50 = vpop.permute.xlu0 %874 }
 0x3d8   : > { %v877_v13 = vsub.f32 %v2163_v52, %v875_v50 }
 0x3da   : > { %v878_v21 = vmul.f32 1.442695, %v877_v13 }
 0x3dc   : > { %1627 = vpow2.f32 %v878_v21 }
 0x3dd   : > { %1629 = vpow2.f32 %v870_v38 }
 0x3e6   : > { %v1628_v39 = vpop.eup %1627 }
 0x3e7   : > { %1383 = vmatmul.mubr.f32.vlgmr.msra.gmra.mrb[0].mxu0 %v1628_v39  ;;  %v882_v34 = vsel %vm864_vm2, %v1628_v39, 0.0  ;;  %v1630_v43 = vpop.eup %1629 }
 0x3e8   : > { %883 = vadd.xlane.f32.xlu1 %v882_v34  ;;  %v881_v15 = vmul.f32 %v1630_v43, %v880_v29 }
 0x3f9   : > { %891 = vperm.xlu1 %1626, %v1630_v43  }
 0x475   : > { %v884_v63 = vpop.xlane.xlu1 %883 }
 0x476   : > { %v885_v0 = vadd.f32 %v884_v63, %v881_v15 }
 0x478   : > { %887 = vst.msk [vmem:[#allocation3] sm:$0xf] %vm886_vm3, %v885_v0 }
 0x479   : > { %v892_v56 = vpop.permute.xlu1 %891 }
 0x47a   : > { %v894_v42 = vmul.f32 %v892_v56, %v888_v4 }
 0x4ba   : > { %v961_v46 = vpop.f32.mrb[0].mxu0 }
 0x4bb   : > { %v965_v33 = vadd.f32 %v961_v46, %v894_v42  ;;  %v1384_v61 = vpop.f32.mrb[1].mxu0 }
 0x4bd   : > { %966 = vst [vmem:[#allocation4] sm:$0xf] %v965_v33 }
 0x4be PF: > { %p1257_p8 = scmp.le.s32.totalorder %s2161_s15, 200 }
 0x4bf   : > { %v973_v10 = vand.u32 (!%p1257_p8), 127, %v404_v3  ;;  %v974_v14 = vstv (!%p1257_p8), %s1255_s13  ;;  %vm979_vm5 = vcmask (!%p1257_p8), 1043456   ;;  %v1670_v44 = vmov (!%p1257_p8), 0  }
 0x4c0   : > { %971 = sbr.rel (%p1257_p8) target bundleno = 1724 (0x6bc), region = 48  ;;  %1631 = vset.pattern.permute.xlu0 (!%p1257_p8), %v1670_v44  ;;  %1632 = vset.pattern.permute.xlu1 (!%p1257_p8), %v1670_v44  ;;  %v1501_v51 = vpack.c.bf16 (!%p1257_p8), %v2111_v9, %v2108_v26  ;;  %v1671_v53 = vmov (!%p1257_p8), 0.0|0.0   ;;  %v1504_v3 = vpack.c.bf16 (!%p1257_p8), %v2117_v58, %v2114_v12  ;;  %v1507_v19 = vpack.c.bf16 (!%p1257_p8), %v2126_v8, %v2123_v47  ;;  %v978_v26 = vld [vmem:[#allocation2] sm:$0xf] (!%p1257_p8) }
 0x4c1   : > { %v975_v16 = vadd.s32 (!%p1257_p8), %v974_v14, %v973_v10  ;;  %1500 = vmatprep.subr.bf16.mxu0 (!%p1257_p8), %v1671_v53  ;;  %v1510_v18 = vpack.c.bf16 (!%p1257_p8), %v2132_v20, %v2129_v7  ;;  %vm1001_vm7 = vcmask (!%p1257_p8), 3072   ;;  %v1513_v12 = vpack.c.bf16 (!%p1257_p8), %v2138_v55, %v2135_v25 }
 0x4c2   : > { %1502 = vmatpush3.bf16.msra.mxu0 (!%p1257_p8), %v1501_v51  ;;  %v1516_v47 = vpack.c.bf16 (!%p1257_p8), %v2144_v54, %v2141_v28  ;;  %v1519_v8 = vpack.c.bf16 (!%p1257_p8), %v2150_v24, %v2147_v62  ;;  %vm1672_vm8 = vmmov (!%p1257_p8), 0   ;;  %v1673_v7 = vmov (!%p1257_p8), 0.0   ;;  %v995_v24 = vld [vmem:[#allocation3] sm:$0xf] (!%p1257_p8) }
 0x4c3   : > { %vm976_vm6 = vcmp.lt.s32.totalorder (!%p1257_p8), %v975_v16, 200  ;;  %1503 = vmatprep.subr.bf16.mxu0 (!%p1257_p8), %v1671_v53  ;;  %1417 = vmatprep.mubr.msk.f32.mxu0 (!%p1257_p8), %vm1672_vm8, %v1673_v7  ;;  %v1522_v20 = vpack.c.bf16 (!%p1257_p8), %v2156_v59, %v2153_v57 }
 0x4c4   : > { %v977_v40 = vsel (!%p1257_p8), %vm976_vm6, %v2163_v52, -1e+30  ;;  %v1003_v57 = vld [vmem:[#allocation4] sm:$0xf] (!%p1257_p8) }
 0x4c5   : > { %v980_v6 = vsel (!%p1257_p8), %vm979_vm5, %v977_v40, -inf }
 0x4c6   : > { %981 = vmax.xlane.f32.xlu0 (!%p1257_p8), %v980_v6  ;;  %1505 = vmatpush3.bf16.msra.mxu0 (!%p1257_p8), %v1504_v3 }
 0x4c7   : > { %1506 = vmatprep.subr.bf16.mxu0 %v1671_v53 }
 0x4ca   : > { %1508 = vmatpush3.bf16.msra.mxu0 %v1507_v19 }
 0x4cb   : > { %1509 = vmatprep.subr.bf16.mxu0 %v1671_v53 }
 0x4ce   : > { %1511 = vmatpush3.bf16.msra.mxu0 %v1510_v18 }
 0x4cf   : > { %1512 = vmatprep.subr.bf16.mxu0 %v1671_v53 }
 0x4d2   : > { %1514 = vmatpush3.bf16.msra.mxu0 %v1513_v12 }
 0x4d3   : > { %1515 = vmatprep.subr.bf16.mxu0 %v1671_v53 }
 0x4d6   : > { %1517 = vmatpush3.bf16.msra.mxu0 %v1516_v47 }
 0x4d7   : > { %1518 = vmatprep.subr.bf16.mxu0 %v1671_v53 }
 0x4da   : > { %1520 = vmatpush3.bf16.msra.mxu0 %v1519_v8 }
 0x4db   : > { %1521 = vmatprep.subr.bf16.mxu0 %v1671_v53 }
 0x4de   : > { %1523 = vmatpush3.bf16.msra.mxu0 %v1522_v20 }
 0x553   : > { %v982_v9 = vpop.xlane.xlu0 %981 }
 0x554   : > { %v983_v22 = vmax.f32 %v978_v26, %v982_v9 }
 0x556   : > { %v984_v58 = vsub.f32 %v978_v26, %v983_v22  ;;  %1082 = vst.msk [vmem:[#allocation2] sm:$0xf] %vm1001_vm7, %v983_v22  ;;  %989 = vperm.xlu0 %1631, %v983_v22  }
 0x558   : > { %v985_v54 = vmul.f32 1.442695, %v984_v58 }
 0x5d5   : > { %v990_v25 = vpop.permute.xlu0 %989 }
 0x5d6   : > { %v992_v55 = vsub.f32 %v977_v40, %v990_v25 }
 0x5d8   : > { %v993_v32 = vmul.f32 1.442695, %v992_v55 }
 0x5da   : > { %1633 = vpow2.f32 %v993_v32 }
 0x5db   : > { %1635 = vpow2.f32 %v985_v54 }
 0x5e4   : > { %v1634_v52 = vpop.eup %1633 }
 0x5e5   : > { %1418 = vmatmul.mubr.f32.vlgmr.msra.gmra.mrb[0].mxu0 %v1634_v52  ;;  %v997_v28 = vsel %vm979_vm5, %v1634_v52, 0.0  ;;  %v1636_v62 = vpop.eup %1635 }
 0x5e6   : > { %998 = vadd.xlane.f32.xlu1 %v997_v28  ;;  %v996_v5 = vmul.f32 %v1636_v62, %v995_v24 }
 0x5f7   : > { %1006 = vperm.xlu1 %1632, %v1636_v62  }
 0x673   : > { %v999_v17 = vpop.xlane.xlu1 %998 }
 0x674   : > { %v1000_v11 = vadd.f32 %v999_v17, %v996_v5 }
 0x676   : > { %1002 = vst.msk [vmem:[#allocation3] sm:$0xf] %vm1001_vm7, %v1000_v11 }
 0x677   : > { %v1007_v59 = vpop.permute.xlu1 %1006 }
 0x678   : > { %v1009_v2 = vmul.f32 %v1007_v59, %v1003_v57 }
 0x6b8   : > { %v1076_v23 = vpop.f32.mrb[0].mxu0 }
 0x6b9   : > { %v1080_v36 = vadd.f32 %v1076_v23, %v1009_v2  ;;  %v1419_v37 = vpop.f32.mrb[1].mxu0 }
 0x6bb   : > { %1081 = vst [vmem:[#allocation4] sm:$0xf] %v1080_v36 }
 0x6bc PF: > { %p1258_p9 = scmp.ne.s32.totalorder %s1651_s24, 1 }
 0x6bd   : > { %v1087_v60 = vld [vmem:[#allocation2] sm:$0xf] (!%p1258_p9)  ;;  %vm1088_vm9 = vcmask (!%p1258_p9), 3072   ;;  %v1090_v27 = vld [vmem:[#allocation3] sm:$0xf] (!%p1258_p9) }
 0x6be   : > { %1086 = sbr.rel (%p1258_p9) target bundleno = 1733 (0x6c5), region = 52  ;;  %1089 = vst.msk [vmem:[%s2239_s5] sm:$0xf] (!%p1258_p9), %vm1088_vm9, %v1087_v60  ;;  %1091 = vst.msk [vmem:[%s2240_s6] sm:$0xf] (!%p1258_p9), %vm1088_vm9, %v1090_v27 }
 0x6c2   : > { %v1092_v1 = vld [vmem:[#allocation4] sm:$0xf] (!%p1258_p9) }
 0x6c3   : > { %1093 = vst [vmem:[%s2241_s7] sm:$0xf] (!%p1258_p9), %v1092_v1 }
 0x6c5 PF: > { %s18_s26 = sadd.s32 1, %s1659_s26   ;;  %s2242_s24 = smov %s1655_s25 }
 0x6c6   : > { %p15_p10 = scmp.ge.s32.totalorder %s18_s26, 4   ;;  %s2243_s25 = smov %s2245_s27 }
 0x6c8   :  { %17 = sbr.rel (!%p15_p10) target bundleno = 2 (0x2), region = 118 }

// kernel: _bclassifier_forward_impl.1
= control target key start
LH: loop header
LB: loop body
LE: loop exit
PB: predicated region body
PF: predicated region fallthrough
CT: control target
= control target key end

     0   :  { %s1714_s24 = smov 0   ;;  %s1716_s25 = smov 0   ;;  %s2234_s0 = inlined_call_operand.vmem [shape: f32[256,128], index: 0, kind: input, shape index: {}]   ;;  %s2235_s1 = inlined_call_operand.vmem [shape: f32[128,256], index: 1, kind: input, shape index: {}]   ;;  %s2236_s2 = inlined_call_operand.vmem [shape: f32[1,256], index: 2, kind: input, shape index: {}]   ;;  %s2237_s3 = inlined_call_operand.vmem [shape: f32[4,128], index: 3, kind: input, shape index: {}]   ;;  %s2238_s4 = inlined_call_operand.vmem [shape: f32[4,256], index: 4, kind: output, shape index: {0}]   ;;  %s2239_s5 = inlined_call_operand.vmem [shape: f32[1,4,1], index: 5, kind: output, shape index: {1}]   ;;  %s2240_s6 = inlined_call_operand.vmem [shape: f32[1,4,1], index: 6, kind: output, shape index: {2}]   ;;  %s2241_s7 = inlined_call_operand.vmem [shape: f32[1,4,128], index: 7, kind: output, shape index: {3}]  }
   0x1   :  { %s1718_s26 = smov 0  }
   0x2 LB: > { %s27_s27 = sadd.s32 1, %s1655_s25  ;;  %p1250_p0 = scmp.ge.s32.totalorder %s1659_s26, 1  ;;  %s1659_s26 = sphi %s1718_s26, %s18_s26   ;;  %s1655_s25 = sphi %s1716_s25, %s2243_s25   ;;  %s1651_s24 = sphi %s1714_s24, %s2242_s24  }
   0x3   : > { %p28_p1 = scmp.ge.s32.totalorder %s27_s27, 2  ;;  %p269_p2 = scmp.lt.s32.totalorder %s1659_s26, 3 }
   0x5   : > { %s2245_s27 = smov (%p28_p1, %s27_s27), 0  ;;  %p270_p3 = pnand %p1250_p0, %p269_p2 }
   0x6   : > { %s1251_s28 = sshll.u32 (!%p270_p3), %s1651_s24, 4  ;;  %p328_p4 = scmp.lt.s32.totalorder (!%p270_p3), %s1651_s24, 1 }
   0x7   : > { %273 = sbr.rel (%p270_p3) target bundleno = 1733 (0x6c5), region = 36  ;;  %p319_p5 = scmp.lt.s32.totalorder (!%p270_p3), %s1251_s28, 31 }
   0x8   : > { %p1254_p6 = scmp.ne.s32.totalorder (!%p270_p3), %s1651_s24, 0 }
   0xe   : > { %s329_s29 = scalar_select %p328_p4, %s1651_s24, 1 }
   0xf   : > { %s2247_s28 = smov (!%p319_p5, %s1251_s28), 31  ;;  %349 = sbr.rel (%p1254_p6) target bundleno = 22 (0x16), region = 40 }
  0x10   : > { %s1253_s30 = sshll.u32 %s329_s29, 2  ;;  %s1252_s8 = sshll.u32 %s2247_s28, 3  ;;  %vm350_vm0 = vcmask (!%p1254_p6), 3072   ;;  %v1661_v0 = vmov (!%p1254_p6), -inf   ;;  %v1662_v1 = vmov (!%p1254_p6), 0.0  }
  0x11   : > { %s1740_s11 = scalar_lea.vmem %s2238_s4, %s1253_s30  ;;  %s1745_s14 = scalar_lea.vmem %s2234_s0, %s1252_s8  ;;  %351 = vst.msk [vmem:[#allocation2] sm:$0xf] (!%p1254_p6), %vm350_vm0, %v1661_v0  ;;  %352 = vst.msk [vmem:[#allocation3] sm:$0xf] (!%p1254_p6), %vm350_vm0, %v1662_v1 }
  0x12   : > { %353 = vst [vmem:[#allocation4] sm:$0xf] (!%p1254_p6), %v1662_v1 }
  0x16 PF: > { %v371_v2 = vld [vmem:[%s2235_s1 + $0x8] sm:$0xff]  ;;  %v373_v3 = vld [vmem:[%s2235_s1 + $0x18] sm:$0xff]  ;;  %v370_v4 = vld [vmem:[%s2235_s1] sm:$0xff]  ;;  %v1663_v9 = vmov 0.0   ;;  %vm1665_vm1 = vmmov 0   ;;  %s1255_s13 = sshll.u32 %s1651_s24, 7 }
  0x17   : > { %v1420_v5 = vpack.c.bf16 %v373_v3, %v371_v2  ;;  %v372_v6 = vld [vmem:[%s2235_s1 + $0x10] sm:$0xff]  ;;  %v375_v7 = vld [vmem:[%s2235_s1 + $0x28] sm:$0xff]  ;;  %v377_v8 = vld [vmem:[%s2235_s1 + $0x38] sm:$0xff]  ;;  %478 = vmatprep.mubr.f32.mxu0 %v1663_v9  ;;  %v404_v3 = vlaneseq  ;;  %1347 = vmatprep.mubr.msk.f32.mxu1 %vm1665_vm1, %v1663_v9  ;;  %s2161_s15 = sadd.s32 128, %s1255_s13 }
  0x18   : > { %v1422_v10 = vpack.c.bf16 %v372_v6, %v370_v4  ;;  %v1424_v11 = vpack.c.bf16 %v377_v8, %v375_v7  ;;  %v374_v12 = vld [vmem:[%s2235_s1 + $0x20] sm:$0xff]  ;;  %v376_v13 = vld [vmem:[%s2235_s1 + $0x30] sm:$0xff]  ;;  %v379_v14 = vld [vmem:[%s2235_s1 + $0x48] sm:$0xff]  ;;  %p1256_p7 = scmp.gt.s32.totalorder %s2161_s15, 200 }
  0x19   : > { %1421 = vmatprep.subr.bf16.mxu0 %v1420_v5  ;;  %v381_v15 = vld [vmem:[%s2235_s1 + $0x58] sm:$0xff]  ;;  %v1426_v16 = vpack.c.bf16 %v376_v13, %v374_v12  ;;  %v378_v18 = vld [vmem:[%s2235_s1 + $0x40] sm:$0xff]  ;;  %v380_v19 = vld [vmem:[%s2235_s1 + $0x50] sm:$0xff]  ;;  %v1877_v4 = vshrl.u32 %v404_v3, 7  ;;  %vm864_vm2 = vcmask (!%p1256_p7), 1043456   ;;  %vm886_vm3 = vcmask (!%p1256_p7), 3072  }
  0x1a   : > { %1423 = vmatpush1.bf16.msra.mxu0 %v1422_v10  ;;  %v1428_v17 = vpack.c.bf16 %v381_v15, %v379_v14  ;;  %v383_v20 = vld [vmem:[%s2235_s1 + $0x68] sm:$0xff]  ;;  %v385_v21 = vld [vmem:[%s2235_s1 + $0x78] sm:$0xff]  ;;  %v1430_v22 = vpack.c.bf16 %v380_v19, %v378_v18  ;;  %v382_v24 = vld [vmem:[%s2235_s1 + $0x60] sm:$0xff]  ;;  %vm1668_vm4 = vmmov (!%p1256_p7), 0  }
  0x1b   : > { %1425 = vmatprep.subr.bf16.mxu0 %v1424_v11  ;;  %v1432_v23 = vpack.c.bf16 %v385_v21, %v383_v20  ;;  %v384_v25 = vld [vmem:[%s2235_s1 + $0x70] sm:$0xff]  ;;  %v387_v26 = vld [vmem:[%s2235_s1 + $0x88] sm:$0xff]  ;;  %v389_v27 = vld [vmem:[%s2235_s1 + $0x98] sm:$0xff]  ;;  %v406_v5 = vsub.s32 0, %v1877_v4 }
  0x1c   : > { %v1434_v28 = vpack.c.bf16 %v384_v25, %v382_v24  ;;  %v1436_v29 = vpack.c.bf16 %v389_v27, %v387_v26  ;;  %v386_v30 = vld [vmem:[%s2235_s1 + $0x80] sm:$0xff]  ;;  %v388_v31 = vld [vmem:[%s2235_s1 + $0x90] sm:$0xff]  ;;  %v391_v32 = vld [vmem:[%s2235_s1 + $0xa8] sm:$0xff] }
  0x1d   : > { %v393_v33 = vld [vmem:[%s2235_s1 + $0xb8] sm:$0xff]  ;;  %v1438_v34 = vpack.c.bf16 %v388_v31, %v386_v30  ;;  %v390_v36 = vld [vmem:[%s2235_s1 + $0xa0] sm:$0xff]  ;;  %v392_v37 = vld [vmem:[%s2235_s1 + $0xb0] sm:$0xff] }
  0x1e   : > { %1427 = vmatpush1.bf16.msra.mxu0 %v1426_v16  ;;  %v1440_v35 = vpack.c.bf16 %v393_v33, %v391_v32  ;;  %v395_v38 = vld [vmem:[%s2235_s1 + $0xc8] sm:$0xff]  ;;  %v397_v39 = vld [vmem:[%s2235_s1 + $0xd8] sm:$0xff]  ;;  %v1442_v40 = vpack.c.bf16 %v392_v37, %v390_v36  ;;  %v394_v42 = vld [vmem:[%s2235_s1 + $0xc0] sm:$0xff] }
  0x1f   : > { %1429 = vmatprep.subr.bf16.mxu0 %v1428_v17  ;;  %v1444_v41 = vpack.c.bf16 %v397_v39, %v395_v38  ;;  %v396_v43 = vld [vmem:[%s2235_s1 + $0xd0] sm:$0xff]  ;;  %v399_v44 = vld [vmem:[%s2235_s1 + $0xe8] sm:$0xff]  ;;  %v401_v45 = vld [vmem:[%s2235_s1 + $0xf8] sm:$0xff] }
  0x20   : > { %v1446_v46 = vpack.c.bf16 %v396_v43, %v394_v42  ;;  %v1448_v47 = vpack.c.bf16 %v401_v45, %v399_v44  ;;  %v398_v48 = vld [vmem:[%s2235_s1 + $0xe0] sm:$0xff]  ;;  %v400_v49 = vld [vmem:[%s2235_s1 + $0xf0] sm:$0xff]  ;;  %v355_v52 = vld [vmem:[%s1745_s14 + $0x8] sm:$0xff] }
  0x21   : > { %v1450_v50 = vpack.c.bf16 %v400_v49, %v398_v48  ;;  %v354_v51 = vld [vmem:[%s1745_s14] sm:$0xff]  ;;  %v356_v53 = vld [vmem:[%s1745_s14 + $0x10] sm:$0xff]  ;;  %v357_v54 = vld [vmem:[%s1745_s14 + $0x18] sm:$0xff]  ;;  %v1664_v49 = vmov 0.0|0.0  }
  0x22   : > { %1431 = vmatpush1.bf16.msra.mxu0 %v1430_v22  ;;  %v358_v55 = vld [vmem:[%s1745_s14 + $0x20] sm:$0xff]  ;;  %v359_v56 = vld [vmem:[%s1745_s14 + $0x28] sm:$0xff]  ;;  %v360_v57 = vld [vmem:[%s1745_s14 + $0x30] sm:$0xff]  ;;  %1452 = vmatprep.subr.bf16.mxu1 %v1664_v49 }
  0x23   : > { %1433 = vmatprep.subr.bf16.mxu0 %v1432_v23  ;;  %v361_v58 = vld [vmem:[%s1745_s14 + $0x38] sm:$0xff]  ;;  %v362_v59 = vld [vmem:[%s1745_s14 + $0x40] sm:$0xff]  ;;  %v363_v60 = vld [vmem:[%s1745_s14 + $0x48] sm:$0xff] }
  0x24   : > { %v364_v61 = vld [vmem:[%s1745_s14 + $0x50] sm:$0xff]  ;;  %v365_v62 = vld [vmem:[%s1745_s14 + $0x58] sm:$0xff]  ;;  %v366_v63 = vld [vmem:[%s1745_s14 + $0x60] sm:$0xff] }
  0x25   : > { %v367_v0 = vld [vmem:[%s1745_s14 + $0x68] sm:$0xff]  ;;  %v368_v1 = vld [vmem:[%s1745_s14 + $0x70] sm:$0xff]  ;;  %v369_v2 = vld [vmem:[%s1745_s14 + $0x78] sm:$0xff] }
  0x26   : > { %1435 = vmatpush1.bf16.msra.mxu0 %v1434_v28  ;;  %v1883_v6 = vld [vmem:[%s2236_s2] sm:$0x3] }
  0x27   : > { %1437 = vmatprep.subr.bf16.mxu0 %v1436_v29  ;;  %v1886_v7 = vrot.slane %v1883_v6, %v406_v5 }
  0x2a   : > { %1439 = vmatpush1.bf16.msra.mxu0 %v1438_v34 }
  0x2b   : > { %1441 = vmatprep.subr.bf16.mxu0 %v1440_v35 }
  0x2e   : > { %1443 = vmatpush1.bf16.msra.mxu0 %v1442_v40 }
  0x2f   : > { %1445 = vmatprep.subr.bf16.mxu0 %v1444_v41 }
  0x32   : > { %1447 = vmatpush1.bf16.msra.mxu0 %v1446_v46 }
  0x33   : > { %1449 = vmatprep.subr.bf16.mxu0 %v1448_v47 }
  0x36   : > { %1451 = vmatpush1.bf16.msra.mxu0 %v1450_v50 }
  0x39   : > { %479 = vmatmul.mubr.f32.vlgmr.msra.gmra.mrb[0].mxu0 %v354_v51 }
  0x3a   : > { %484 = vmatprep.mubr.f32.mxu0 %v1663_v9 }
  0x3d   : > { %485 = vmatmul.mubr.f32.gmra.mrb[2].mxu0 %v355_v52 }
  0x3e   : > { %490 = vmatprep.mubr.f32.mxu0 %v1663_v9 }
  0x41   : > { %491 = vmatmul.mubr.f32.gmra.mrb[4].mxu0 %v356_v53 }
  0x42   : > { %496 = vmatprep.mubr.f32.mxu0 %v1663_v9 }
  0x45   : > { %497 = vmatmul.mubr.f32.gmra.mrb[6].mxu0 %v357_v54 }
  0x46   : > { %502 = vmatprep.mubr.f32.mxu0 %v1663_v9 }
  0x49   : > { %503 = vmatmul.mubr.f32.gmra.mrb[8].mxu0 %v358_v55 }
  0x4a   : > { %508 = vmatprep.mubr.f32.mxu0 %v1663_v9 }
  0x4d   : > { %509 = vmatmul.mubr.f32.gmra.mrb[10].mxu0 %v359_v56 }
  0x4e   : > { %514 = vmatprep.mubr.f32.mxu0 %v1663_v9 }
  0x51   : > { %515 = vmatmul.mubr.f32.gmra.mrb[12].mxu0 %v360_v57  ;;  %v410_v57 = vsub.s32 1, %v1877_v4 }
  0x52   : > { %520 = vmatprep.mubr.f32.mxu0 %v1663_v9 }
  0x55   : > { %521 = vmatmul.mubr.f32.gmra.mrb[14].mxu0 %v361_v58 }
  0x56   : > { %526 = vmatprep.mubr.f32.mxu0 %v1663_v9 }
  0x59   : > { %527 = vmatmul.mubr.f32.gmra.mrb[16].mxu0 %v362_v59 }
  0x5a   : > { %532 = vmatprep.mubr.f32.mxu0 %v1663_v9 }
  0x5d   : > { %533 = vmatmul.mubr.f32.gmra.mrb[18].mxu0 %v363_v60 }
  0x5e   : > { %538 = vmatprep.mubr.f32.mxu0 %v1663_v9 }
  0x61   : > { %539 = vmatmul.mubr.f32.gmra.mrb[20].mxu0 %v364_v61 }
  0x62   : > { %544 = vmatprep.mubr.f32.mxu0 %v1663_v9 }
  0x65   : > { %545 = vmatmul.mubr.f32.gmra.mrb[22].mxu0 %v365_v62  ;;  %v1974_v62 = vrot.slane %v1883_v6, %v410_v57 }
  0x66   : > { %550 = vmatprep.mubr.f32.mxu0 %v1663_v9 }
  0x69   : > { %551 = vmatmul.mubr.f32.gmra.mrb[24].mxu0 %v366_v63 }
  0x6a   : > { %556 = vmatprep.mubr.f32.mxu0 %v1663_v9 }
  0x6d   : > { %557 = vmatmul.mubr.f32.gmra.mrb[26].mxu0 %v367_v0 }
  0x6e   : > { %562 = vmatprep.mubr.f32.mxu0 %v1663_v9 }
  0x71   : > { %563 = vmatmul.mubr.f32.gmra.mrb[28].mxu0 %v368_v1 }
  0x72   : > { %568 = vmatprep.mubr.f32.mxu0 %v1663_v9 }
  0x75   : > { %569 = vmatmul.mubr.f32.gmra.mrb[30].mxu0 %v369_v2 }
 0x10c   : > { %v480_v8 = vpop.f32.mrb[0].mxu0 }
 0x10d   : > { %v1889_v10 = vadd.f32 %v480_v8, %v1886_v7  ;;  %v1891_v11 = vpop.f32.mrb[1].mxu0 }
 0x10e   : > { %v483_v4 = vadd.f32 %v1891_v11, %v1974_v62 }
 0x10f   : > { %v575_v12 = vmul.f32 %v1889_v10, %v1889_v10 }
 0x110   : > { %v486_v13 = vpop.f32.mrb[2].mxu0 }
 0x111   : > { %v1896_v14 = vadd.f32 %v486_v13, %v1886_v7  ;;  %v1898_v15 = vpop.f32.mrb[3].mxu0  ;;  %591 = vadd.xlane.f32.xlu0 %v575_v12  ;;  %v1988_v13 = vmax.f32 %v483_v4, 0.0 }
 0x113   : > { %v576_v16 = vmul.f32 %v1896_v14, %v1896_v14 }
 0x114   : > { %v492_v17 = vpop.f32.mrb[4].mxu0 }
 0x115   : > { %v1903_v18 = vadd.f32 %v492_v17, %v1886_v7  ;;  %v1905_v19 = vpop.f32.mrb[5].mxu0  ;;  %593 = vadd.xlane.f32.xlu0 %v576_v16  ;;  %v489_v16 = vadd.f32 %v1898_v15, %v1974_v62 }
 0x116   : > { %v495_v17 = vadd.f32 %v1905_v19, %v1974_v62 }
 0x117   : > { %v577_v20 = vmul.f32 %v1903_v18, %v1903_v18 }
 0x118   : > { %v498_v21 = vpop.f32.mrb[6].mxu0  ;;  %v2005_v15 = vmax.f32 %v495_v17, 0.0 }
 0x119   : > { %v1910_v22 = vadd.f32 %v498_v21, %v1886_v7  ;;  %v1912_v23 = vpop.f32.mrb[7].mxu0  ;;  %595 = vadd.xlane.f32.xlu1 %v577_v20 }
 0x11b   : > { %v578_v24 = vmul.f32 %v1910_v22, %v1910_v22 }
 0x11c   : > { %v504_v25 = vpop.f32.mrb[8].mxu0 }
 0x11d   : > { %v1917_v26 = vadd.f32 %v504_v25, %v1886_v7  ;;  %v1919_v27 = vpop.f32.mrb[9].mxu0  ;;  %597 = vadd.xlane.f32.xlu1 %v578_v24  ;;  %v501_v25 = vadd.f32 %v1912_v23, %v1974_v62 }
 0x11e   : > { %v507_v19 = vadd.f32 %v1919_v27, %v1974_v62  ;;  %v689_v27 = vmul.f32 %v2005_v15, %v2005_v15 }
 0x11f   : > { %v579_v28 = vmul.f32 %v1917_v26, %v1917_v26 }
 0x120   : > { %v510_v29 = vpop.f32.mrb[10].mxu0 }
 0x121   : > { %v1924_v30 = vadd.f32 %v510_v29, %v1886_v7  ;;  %v1926_v31 = vpop.f32.mrb[11].mxu0  ;;  %599 = vadd.xlane.f32.xlu0 %v579_v28  ;;  %v687_v28 = vmul.f32 %v1988_v13, %v1988_v13  ;;  %v2003_v29 = vmax.f32 %v489_v16, 0.0 }
 0x122   : > { %v513_v23 = vadd.f32 %v1926_v31, %v1974_v62 }
 0x123   : > { %v580_v32 = vmul.f32 %v1924_v30, %v1924_v30 }
 0x124   : > { %v516_v33 = vpop.f32.mrb[12].mxu0 }
 0x125   : > { %v1931_v34 = vadd.f32 %v516_v33, %v1886_v7  ;;  %v1933_v35 = vpop.f32.mrb[13].mxu0  ;;  %601 = vadd.xlane.f32.xlu1 %v580_v32  ;;  %v2015_v33 = vmax.f32 %v507_v19, 0.0 }
 0x127   : > { %v581_v36 = vmul.f32 %v1931_v34, %v1931_v34 }
 0x128   : > { %v522_v37 = vpop.f32.mrb[14].mxu0 }
 0x129   : > { %v1938_v38 = vadd.f32 %v522_v37, %v1886_v7  ;;  %v1940_v39 = vpop.f32.mrb[15].mxu0  ;;  %603 = vadd.xlane.f32.xlu0 %v581_v36  ;;  %v519_v36 = vadd.f32 %v1933_v35, %v1974_v62  ;;  %v688_v37 = vmul.f32 %v2003_v29, %v2003_v29 }
 0x12a   : > { %v525_v31 = vadd.f32 %v1940_v39, %v1974_v62 }
 0x12b   : > { %v582_v40 = vmul.f32 %v1938_v38, %v1938_v38 }
 0x12c   : > { %v528_v41 = vpop.f32.mrb[16].mxu0 }
 0x12d   : > { %v1945_v42 = vadd.f32 %v528_v41, %v1886_v7  ;;  %v1947_v43 = vpop.f32.mrb[17].mxu0  ;;  %605 = vadd.xlane.f32.xlu1 %v582_v40  ;;  %v2023_v40 = vmax.f32 %v513_v23, 0.0 }
 0x12e   : > { %v531_v35 = vadd.f32 %v1947_v43, %v1974_v62 }
 0x12f   : > { %v583_v44 = vmul.f32 %v1945_v42, %v1945_v42 }
 0x130   : > { %v534_v45 = vpop.f32.mrb[18].mxu0 }
 0x131   : > { %v1952_v46 = vadd.f32 %v534_v45, %v1886_v7  ;;  %v1954_v47 = vpop.f32.mrb[19].mxu0  ;;  %607 = vadd.xlane.f32.xlu0 %v583_v44  ;;  %v2027_v44 = vmax.f32 %v519_v36, 0.0  ;;  %v691_v45 = vmul.f32 %v2015_v33, %v2015_v33 }
 0x133   : > { %v584_v48 = vmul.f32 %v1952_v46, %v1952_v46  ;;  %v693_v43 = vmul.f32 %v2027_v44, %v2027_v44 }
 0x134   : > { %v540_v50 = vpop.f32.mrb[20].mxu0 }
 0x135   : > { %v1960_v51 = vadd.f32 %v540_v50, %v1886_v7  ;;  %v542_v52 = vpop.f32.mrb[21].mxu0  ;;  %609 = vadd.xlane.f32.xlu1 %v584_v48  ;;  %v537_v48 = vadd.f32 %v1954_v47, %v1974_v62  ;;  %v692_v50 = vmul.f32 %v2023_v40, %v2023_v40 }
 0x136   : > { %v543_v39 = vadd.f32 %v542_v52, %v1974_v62 }
 0x137   : > { %v585_v53 = vmul.f32 %v1960_v51, %v1960_v51  ;;  %v2046_v57 = vmax.f32 %v537_v48, 0.0 }
 0x138   : > { %v546_v54 = vpop.f32.mrb[22].mxu0 }
 0x139   : > { %v1965_v55 = vadd.f32 %v546_v54, %v1886_v7  ;;  %v548_v56 = vpop.f32.mrb[23].mxu0  ;;  %611 = vadd.xlane.f32.xlu0 %v585_v53  ;;  %v2039_v53 = vmax.f32 %v525_v31, 0.0  ;;  %v2041_v54 = vmax.f32 %v531_v35, 0.0  ;;  %v696_v4 = vmul.f32 %v2046_v57, %v2046_v57 }
 0x13b   : > { %v586_v58 = vmul.f32 %v1965_v55, %v1965_v55 }
 0x13c   : > { %v552_v59 = vpop.f32.mrb[24].mxu0 }
 0x13d   : > { %v1971_v60 = vadd.f32 %v552_v59, %v1886_v7  ;;  %v554_v61 = vpop.f32.mrb[25].mxu0  ;;  %613 = vadd.xlane.f32.xlu1 %v586_v58  ;;  %v549_v58 = vadd.f32 %v548_v56, %v1974_v62  ;;  %v2049_v59 = vmax.f32 %v543_v39, 0.0 }
 0x13e   : > { %v555_v47 = vadd.f32 %v554_v61, %v1974_v62 }
 0x13f   : > { %v587_v63 = vmul.f32 %v1971_v60, %v1971_v60  ;;  %v2056_v52 = vmax.f32 %v549_v58, 0.0  ;;  %v697_v61 = vmul.f32 %v2049_v59, %v2049_v59 }
 0x140   : > { %v558_v0 = vpop.f32.mrb[26].mxu0 }
 0x141   : > { %v1979_v1 = vadd.f32 %v558_v0, %v1886_v7  ;;  %v560_v2 = vpop.f32.mrb[27].mxu0  ;;  %615 = vadd.xlane.f32.xlu0 %v587_v63  ;;  %v694_v63 = vmul.f32 %v2039_v53, %v2039_v53  ;;  %v695_v0 = vmul.f32 %v2041_v54, %v2041_v54  ;;  %v698_v16 = vmul.f32 %v2056_v52, %v2056_v52 }
 0x142   : > { %v561_v56 = vadd.f32 %v560_v2, %v1974_v62 }
 0x143   : > { %v588_v5 = vmul.f32 %v1979_v1, %v1979_v1 }
 0x144   : > { %v564_v8 = vpop.f32.mrb[28].mxu0  ;;  %v2068_v17 = vmax.f32 %v561_v56, 0.0 }
 0x145   : > { %v1986_v12 = vadd.f32 %v564_v8, %v1886_v7  ;;  %v566_v6 = vpop.f32.mrb[29].mxu0  ;;  %617 = vadd.xlane.f32.xlu1 %v588_v5  ;;  %v2060_v5 = vmax.f32 %v555_v47, 0.0 }
 0x146   : > { %v567_v8 = vadd.f32 %v566_v6, %v1974_v62  ;;  %v700_v6 = vmul.f32 %v2068_v17, %v2068_v17 }
 0x147   : > { %v589_v11 = vmul.f32 %v1986_v12, %v1986_v12 }
 0x148   : > { %v570_v20 = vpop.f32.mrb[30].mxu0 }
 0x149   : > { %v1997_v21 = vadd.f32 %v570_v20, %v1886_v7  ;;  %v572_v24 = vpop.f32.mrb[31].mxu0  ;;  %619 = vadd.xlane.f32.xlu0 %v589_v11  ;;  %v2011_v7 = vmax.f32 %v501_v25, 0.0  ;;  %v2070_v11 = vmax.f32 %v567_v8, 0.0  ;;  %v699_v25 = vmul.f32 %v2060_v5, %v2060_v5 }
 0x14a   : > { %v573_v20 = vadd.f32 %v572_v24, %v1974_v62 }
 0x14b   : > { %v590_v32 = vmul.f32 %v1997_v21, %v1997_v21  ;;  %v690_v41 = vmul.f32 %v2011_v7, %v2011_v7 }
 0x14c   : > { %v2075_v2 = vmax.f32 %v573_v20, 0.0 }
 0x14d   : > { %621 = vadd.xlane.f32.xlu1 %v590_v32  ;;  %703 = vadd.xlane.f32.xlu0 %v687_v28  ;;  %v701_v28 = vmul.f32 %v2070_v11, %v2070_v11 }
 0x14e   : > { %v702_v19 = vmul.f32 %v2075_v2, %v2075_v2 }
 0x151   : > { %705 = vadd.xlane.f32.xlu1 %v688_v37  ;;  %707 = vadd.xlane.f32.xlu0 %v689_v27 }
 0x155   : > { %709 = vadd.xlane.f32.xlu1 %v690_v41  ;;  %711 = vadd.xlane.f32.xlu0 %v691_v45 }
 0x159   : > { %713 = vadd.xlane.f32.xlu1 %v692_v50  ;;  %715 = vadd.xlane.f32.xlu0 %v693_v43 }
 0x15d   : > { %717 = vadd.xlane.f32.xlu1 %v694_v63  ;;  %719 = vadd.xlane.f32.xlu0 %v695_v0 }
 0x161   : > { %721 = vadd.xlane.f32.xlu1 %v696_v4  ;;  %723 = vadd.xlane.f32.xlu0 %v697_v61 }
 0x165   : > { %725 = vadd.xlane.f32.xlu1 %v698_v16  ;;  %727 = vadd.xlane.f32.xlu0 %v699_v25 }
 0x169   : > { %729 = vadd.xlane.f32.xlu1 %v700_v6  ;;  %731 = vadd.xlane.f32.xlu0 %v701_v28 }
 0x16d   : > { %733 = vadd.xlane.f32.xlu1 %v702_v19 }
 0x19e   : > { %v592_v62 = vpop.xlane.xlu0 %591 }
 0x19f   : > { %v623_v24 = vmax.f32 %v592_v62, 1e-24 }
 0x1a1   : > { %1561 = vrsqrt.f32 %v623_v24 }
 0x1a2   : > { %v594_v32 = vpop.xlane.xlu0 %593 }
 0x1a3   : > { %v624_v23 = vmax.f32 %v594_v32, 1e-24 }
 0x1a5   : > { %1563 = vrsqrt.f32 %v624_v23 }
 0x1a6   : > { %v596_v36 = vpop.xlane.xlu1 %595 }
 0x1a7   : > { %v625_v37 = vmax.f32 %v596_v36, 1e-24 }
 0x1a9   : > { %1565 = vrsqrt.f32 %v625_v37 }
 0x1aa   : > { %v598_v27 = vpop.xlane.xlu1 %597 }
 0x1ab   : > { %v626_v41 = vmax.f32 %v598_v27, 1e-24  ;;  %v1562_v31 = vpop.eup %1561 }
 0x1ac   : > { %v655_v50 = vmul.f32 %v1562_v31, %v1889_v10 }
 0x1ad   : > { %1567 = vrsqrt.f32 %v626_v41 }
 0x1ae   : > { %v600_v35 = vpop.xlane.xlu0 %599 }
 0x1af   : > { %v1564_v45 = vpop.eup %1563  ;;  %v627_v48 = vmax.f32 %v600_v35, 1e-24 }
 0x1b0   : > { %v656_v9 = vmul.f32 %v1564_v45, %v1896_v14 }
 0x1b1   : > { %1569 = vrsqrt.f32 %v627_v48 }
 0x1b2   : > { %v602_v39 = vpop.xlane.xlu1 %601  ;;  %v1453_v43 = vpack.c.bf16 %v656_v9, %v655_v50 }
 0x1b3   : > { %v628_v58 = vmax.f32 %v602_v39, 1e-24  ;;  %v1566_v47 = vpop.eup %1565 }
 0x1b4   : > { %1454 = vmatpush3.bf16.xpose.msra.mxu1 %v1453_v43  ;;  %v657_v56 = vmul.f32 %v1566_v47, %v1903_v18 }
 0x1b5   : > { %1571 = vrsqrt.f32 %v628_v58  ;;  %1455 = vmatprep.subr.bf16.mxu1 %v1664_v49 }
 0x1b6   : > { %v604_v63 = vpop.xlane.xlu0 %603 }
 0x1b7   : > { %v1568_v0 = vpop.eup %1567  ;;  %v629_v4 = vmax.f32 %v604_v63, 1e-24 }
 0x1b8   : > { %v658_v8 = vmul.f32 %v1568_v0, %v1910_v22 }
 0x1b9   : > { %1573 = vrsqrt.f32 %v629_v4 }
 0x1ba   : > { %v606_v61 = vpop.xlane.xlu1 %605  ;;  %v1456_v10 = vpack.c.bf16 %v658_v8, %v657_v56 }
 0x1bb   : > { %v630_v14 = vmax.f32 %v606_v61, 1e-24  ;;  %v1570_v16 = vpop.eup %1569 }
 0x1bc   : > { %1457 = vmatpush3.bf16.xpose.msra.mxu1 %v1456_v10  ;;  %v659_v28 = vmul.f32 %v1570_v16, %v1917_v26 }
 0x1bd   : > { %1575 = vrsqrt.f32 %v630_v14  ;;  %1458 = vmatprep.subr.bf16.mxu1 %v1664_v49 }
 0x1be   : > { %v608_v20 = vpop.xlane.xlu0 %607 }
 0x1bf   : > { %v1572_v25 = vpop.eup %1571  ;;  %v631_v6 = vmax.f32 %v608_v20, 1e-24 }
 0x1c0   : > { %v660_v19 = vmul.f32 %v1572_v25, %v1924_v30 }
 0x1c1   : > { %1577 = vrsqrt.f32 %v631_v6 }
 0x1c2   : > { %v610_v62 = vpop.xlane.xlu1 %609  ;;  %v1459_v18 = vpack.c.bf16 %v660_v19, %v659_v28 }
 0x1c3   : > { %v632_v22 = vmax.f32 %v610_v62, 1e-24  ;;  %v1574_v24 = vpop.eup %1573 }
 0x1c4   : > { %1460 = vmatpush3.bf16.xpose.msra.mxu1 %v1459_v18  ;;  %v661_v37 = vmul.f32 %v1574_v24, %v1931_v34 }
 0x1c5   : > { %1579 = vrsqrt.f32 %v632_v22  ;;  %1461 = vmatprep.subr.bf16.mxu1 %v1664_v49 }
 0x1c6   : > { %v612_v32 = vpop.xlane.xlu0 %611 }
 0x1c7   : > { %v1576_v23 = vpop.eup %1575  ;;  %v633_v36 = vmax.f32 %v612_v32, 1e-24 }
 0x1c8   : > { %v662_v27 = vmul.f32 %v1576_v23, %v1938_v38 }
 0x1c9   : > { %1581 = vrsqrt.f32 %v633_v36 }
 0x1ca   : > { %v614_v41 = vpop.xlane.xlu1 %613  ;;  %v1462_v26 = vpack.c.bf16 %v662_v27, %v661_v37 }
 0x1cb   : > { %v634_v30 = vmax.f32 %v614_v41, 1e-24  ;;  %v1578_v31 = vpop.eup %1577 }
 0x1cc   : > { %1463 = vmatpush3.bf16.xpose.msra.mxu1 %v1462_v26  ;;  %v663_v50 = vmul.f32 %v1578_v31, %v1945_v42 }
 0x1cd   : > { %1583 = vrsqrt.f32 %v634_v30  ;;  %1464 = vmatprep.subr.bf16.mxu1 %v1664_v49 }
 0x1ce   : > { %v616_v35 = vpop.xlane.xlu0 %615 }
 0x1cf   : > { %v1580_v45 = vpop.eup %1579  ;;  %v635_v48 = vmax.f32 %v616_v35, 1e-24 }
 0x1d0   : > { %v664_v9 = vmul.f32 %v1580_v45, %v1952_v46 }
 0x1d1   : > { %1585 = vrsqrt.f32 %v635_v48 }
 0x1d2   : > { %v618_v39 = vpop.xlane.xlu1 %617  ;;  %v1465_v34 = vpack.c.bf16 %v664_v9, %v663_v50 }
 0x1d3   : > { %v636_v38 = vmax.f32 %v618_v39, 1e-24  ;;  %v1582_v43 = vpop.eup %1581 }
 0x1d4   : > { %1466 = vmatpush3.bf16.xpose.msra.mxu1 %v1465_v34  ;;  %v665_v0 = vmul.f32 %v1582_v43, %v1960_v51 }
 0x1d5   : > { %1587 = vrsqrt.f32 %v636_v38  ;;  %1467 = vmatprep.subr.bf16.mxu1 %v1664_v49 }
 0x1d6   : > { %v620_v58 = vpop.xlane.xlu0 %619 }
 0x1d7   : > { %v1584_v47 = vpop.eup %1583  ;;  %v637_v63 = vmax.f32 %v620_v58, 1e-24 }
 0x1d8   : > { %v666_v4 = vmul.f32 %v1584_v47, %v1965_v55 }
 0x1d9   : > { %1589 = vrsqrt.f32 %v637_v63 }
 0x1da   : > { %v622_v56 = vpop.xlane.xlu1 %621  ;;  %v704_v42 = vpop.xlane.xlu0 %703  ;;  %v1468_v8 = vpack.c.bf16 %v666_v4, %v665_v0 }
 0x1db   : > { %v638_v46 = vmax.f32 %v622_v56, 1e-24  ;;  %v735_v61 = vmax.f32 %v704_v42, 1e-24  ;;  %v1586_v10 = vpop.eup %1585 }
 0x1dc   : > { %1469 = vmatpush3.bf16.xpose.msra.mxu1 %v1468_v8  ;;  %v667_v51 = vmul.f32 %v1586_v10, %v1971_v60 }
 0x1dd   : > { %1591 = vrsqrt.f32 %v638_v46  ;;  %1470 = vmatprep.subr.bf16.mxu1 %v1664_v49 }
 0x1de   : > { %1593 = vrsqrt.f32 %v735_v61  ;;  %v706_v14 = vpop.xlane.xlu1 %705  ;;  %v708_v16 = vpop.xlane.xlu0 %707 }
 0x1df   : > { %v1588_v20 = vpop.eup %1587  ;;  %v736_v25 = vmax.f32 %v706_v14, 1e-24  ;;  %v737_v6 = vmax.f32 %v708_v16, 1e-24 }
 0x1e0   : > { %v668_v55 = vmul.f32 %v1588_v20, %v1979_v1 }
 0x1e1   : > { %1595 = vrsqrt.f32 %v736_v25 }
 0x1e2   : > { %1597 = vrsqrt.f32 %v737_v6  ;;  %v710_v28 = vpop.xlane.xlu1 %709  ;;  %v712_v19 = vpop.xlane.xlu0 %711  ;;  %v1471_v62 = vpack.c.bf16 %v668_v55, %v667_v51 }
 0x1e3   : > { %v738_v18 = vmax.f32 %v710_v28, 1e-24  ;;  %v739_v22 = vmax.f32 %v712_v19, 1e-24  ;;  %v1590_v24 = vpop.eup %1589 }
 0x1e4   : > { %1472 = vmatpush3.bf16.xpose.msra.mxu1 %v1471_v62  ;;  %v669_v1 = vmul.f32 %v1590_v24, %v1986_v12 }
 0x1e5   : > { %1599 = vrsqrt.f32 %v738_v18  ;;  %1473 = vmatprep.subr.bf16.mxu1 %v1664_v49 }
 0x1e6   : > { %1601 = vrsqrt.f32 %v739_v22  ;;  %v714_v32 = vpop.xlane.xlu1 %713  ;;  %v716_v23 = vpop.xlane.xlu0 %715 }
 0x1e7   : > { %v1592_v36 = vpop.eup %1591  ;;  %v740_v37 = vmax.f32 %v714_v32, 1e-24  ;;  %v741_v60 = vmax.f32 %v716_v23, 1e-24  ;;  %v1667_v23 = vmov (!%p1256_p7), 0.0|0.0  }
 0x1e8   : > { %v1594_v27 = vpop.eup %1593  ;;  %v670_v41 = vmul.f32 %v1592_v36, %v1997_v21  ;;  %1476 = vmatprep.subr.bf16.mxu0 (!%p1256_p7), %v1667_v23 }
 0x1e9   : > { %v2108_v26 = vmul.f32 %v1594_v27, %v1988_v13  ;;  %1603 = vrsqrt.f32 %v740_v37  ;;  %v863_v27 = vld [vmem:[#allocation2] sm:$0xf] (!%p1256_p7) }
 0x1ea   : > { %1605 = vrsqrt.f32 %v741_v60  ;;  %v718_v30 = vpop.xlane.xlu1 %717  ;;  %v720_v31 = vpop.xlane.xlu0 %719  ;;  %v1474_v35 = vpack.c.bf16 %v670_v41, %v669_v1 }
 0x1eb   : > { %v1596_v49 = vpop.eup %1595  ;;  %v742_v45 = vmax.f32 %v718_v30, 1e-24  ;;  %v743_v48 = vmax.f32 %v720_v31, 1e-24 }
 0x1ec   : > { %v1598_v50 = vpop.eup %1597  ;;  %v2111_v9 = vmul.f32 %v1596_v49, %v2003_v29  ;;  %1475 = vmatpush3.bf16.xpose.msra.mxu1 %v1474_v35  ;;  %v783_v29 = vld [vmem:[%s2237_s3] sm:$0xf] }
 0x1ed   : > { %v2114_v12 = vmul.f32 %v1598_v50, %v2005_v15  ;;  %1607 = vrsqrt.f32 %v742_v45  ;;  %v1669_v45 = vmov (!%p1256_p7), 0.0  }
 0x1ee   : > { %1609 = vrsqrt.f32 %v743_v48  ;;  %v722_v13 = vpop.xlane.xlu1 %721  ;;  %v724_v21 = vpop.xlane.xlu0 %723  ;;  %1382 = vmatprep.mubr.msk.f32.mxu0 (!%p1256_p7), %vm1668_vm4, %v1669_v45 }
 0x1ef   : > { %v1600_v39 = vpop.eup %1599  ;;  %v744_v34 = vmax.f32 %v722_v13, 1e-24  ;;  %v745_v38 = vmax.f32 %v724_v21, 1e-24 }
 0x1f0   : > { %v1602_v43 = vpop.eup %1601  ;;  %v2117_v58 = vmul.f32 %v1600_v39, %v2011_v7 }
 0x1f1   : > { %v2123_v47 = vmul.f32 %v1602_v43, %v2015_v33  ;;  %1611 = vrsqrt.f32 %v744_v34 }
 0x1f2   : > { %1613 = vrsqrt.f32 %v745_v38  ;;  %v726_v15 = vpop.xlane.xlu1 %725  ;;  %v728_v63 = vpop.xlane.xlu0 %727  ;;  %v1480_v36 = vpack.c.bf16 (!%p1256_p7), %v2117_v58, %v2114_v12 }
 0x1f3   : > { %v1604_v0 = vpop.eup %1603  ;;  %v746_v4 = vmax.f32 %v726_v15, 1e-24  ;;  %v747_v56 = vmax.f32 %v728_v63, 1e-24  ;;  %1348 = vmatmul.mubr.f32.vlgmr.msra.gmra.mrb[0].mxu1 %v783_v29  ;;  %v880_v29 = vld [vmem:[#allocation3] sm:$0xf] (!%p1256_p7) }
 0x1f4   : > { %v1606_v42 = vpop.eup %1605  ;;  %v2126_v8 = vmul.f32 %v1604_v0, %v2023_v40 }
 0x1f5   : > { %v2129_v7 = vmul.f32 %v1606_v42, %v2027_v44  ;;  %1615 = vrsqrt.f32 %v746_v4  ;;  %v888_v4 = vld [vmem:[#allocation4] sm:$0xf] (!%p1256_p7) }
 0x1f6   : > { %1617 = vrsqrt.f32 %v747_v56  ;;  %v730_v46 = vpop.xlane.xlu1 %729  ;;  %v732_v33 = vpop.xlane.xlu0 %731  ;;  %v1483_v37 = vpack.c.bf16 (!%p1256_p7), %v2126_v8, %v2123_v47 }
 0x1f7   : > { %v1608_v61 = vpop.eup %1607  ;;  %v748_v10 = vmax.f32 %v730_v46, 1e-24  ;;  %v749_v14 = vmax.f32 %v732_v33, 1e-24 }
 0x1f8   : > { %v1610_v16 = vpop.eup %1609  ;;  %v2132_v20 = vmul.f32 %v1608_v61, %v2039_v53 }
 0x1f9   : > { %v2135_v25 = vmul.f32 %v1610_v16, %v2041_v54  ;;  %1619 = vrsqrt.f32 %v748_v10 }
 0x1fa   : > { %1621 = vrsqrt.f32 %v749_v14  ;;  %v734_v40 = vpop.xlane.xlu1 %733  ;;  %v1486_v60 = vpack.c.bf16 (!%p1256_p7), %v2132_v20, %v2129_v7 }
 0x1fb   : > { %v1612_v6 = vpop.eup %1611  ;;  %v750_v44 = vmax.f32 %v734_v40, 1e-24 }
 0x1fc   : > { %v1614_v51 = vpop.eup %1613  ;;  %v2138_v55 = vmul.f32 %v1612_v6, %v2046_v57 }
 0x1fd   : > { %v2141_v28 = vmul.f32 %v1614_v51, %v2049_v59  ;;  %1623 = vrsqrt.f32 %v750_v44 }
 0x1fe   : > { %v1489_v30 = vpack.c.bf16 (!%p1256_p7), %v2138_v55, %v2135_v25 }
 0x1ff   : > { %v1616_v53 = vpop.eup %1615 }
 0x200   : > { %v1618_v19 = vpop.eup %1617  ;;  %v2144_v54 = vmul.f32 %v1616_v53, %v2056_v52 }
 0x201   : > { %v2147_v62 = vmul.f32 %v1618_v19, %v2060_v5 }
 0x202   : > { %v1492_v35 = vpack.c.bf16 (!%p1256_p7), %v2144_v54, %v2141_v28 }
 0x203   : > { %v1620_v18 = vpop.eup %1619 }
 0x204   : > { %v1622_v22 = vpop.eup %1621  ;;  %v2150_v24 = vmul.f32 %v1620_v18, %v2068_v17 }
 0x205   : > { %v2153_v57 = vmul.f32 %v1622_v22, %v2070_v11  ;;  %v1666_v11 = vmov (!%p1256_p7), 0  }
 0x206   : > { %1625 = vset.pattern.permute.xlu0 (!%p1256_p7), %v1666_v11  ;;  %1626 = vset.pattern.permute.xlu1 (!%p1256_p7), %v1666_v11  ;;  %v1495_v49 = vpack.c.bf16 (!%p1256_p7), %v2150_v24, %v2147_v62 }
 0x207   : > { %v1624_v32 = vpop.eup %1623 }
 0x208   : > { %v2156_v59 = vmul.f32 %v1624_v32, %v2075_v2  ;;  %v1477_v2 = vpack.c.bf16 (!%p1256_p7), %v2111_v9, %v2108_v26 }
 0x20a   : > { %1478 = vmatpush3.bf16.msra.mxu0 (!%p1256_p7), %v1477_v2  ;;  %v1498_v48 = vpack.c.bf16 (!%p1256_p7), %v2156_v59, %v2153_v57 }
 0x20b   : > { %1479 = vmatprep.subr.bf16.mxu0 (!%p1256_p7), %v1667_v23 }
 0x20e   : > { %1481 = vmatpush3.bf16.msra.mxu0 (!%p1256_p7), %v1480_v36 }
 0x20f   : > { %1482 = vmatprep.subr.bf16.mxu0 (!%p1256_p7), %v1667_v23 }
 0x212   : > { %1484 = vmatpush3.bf16.msra.mxu0 (!%p1256_p7), %v1483_v37 }
 0x213   : > { %1485 = vmatprep.subr.bf16.mxu0 (!%p1256_p7), %v1667_v23 }
 0x216   : > { %1487 = vmatpush3.bf16.msra.mxu0 (!%p1256_p7), %v1486_v60 }
 0x217   : > { %1488 = vmatprep.subr.bf16.mxu0 (!%p1256_p7), %v1667_v23 }
 0x21a   : > { %1490 = vmatpush3.bf16.msra.mxu0 (!%p1256_p7), %v1489_v30 }
 0x21b   : > { %1491 = vmatprep.subr.bf16.mxu0 (!%p1256_p7), %v1667_v23 }
 0x21e   : > { %1493 = vmatpush3.bf16.msra.mxu0 (!%p1256_p7), %v1492_v35 }
 0x21f   : > { %1494 = vmatprep.subr.bf16.mxu0 (!%p1256_p7), %v1667_v23 }
 0x222   : > { %1496 = vmatpush3.bf16.msra.mxu0 (!%p1256_p7), %v1495_v49 }
 0x223   : > { %1497 = vmatprep.subr.bf16.mxu0 (!%p1256_p7), %v1667_v23 }
 0x226   : > { %1499 = vmatpush3.bf16.msra.mxu0 (!%p1256_p7), %v1498_v48 }
 0x2c1   : > { %862 = sbr.rel (%p1256_p7) target bundleno = 1214 (0x4be), region = 44 }
 0x2c6   : > { %v2163_v52 = vpop.f32.mrb[0].mxu1 }
 0x2c7   : > { %854 = vst [vmem:[%s1740_s11] sm:$0xf] %v2163_v52  ;;  %v1349_v5 = vpop.f32.mrb[1].mxu1  ;;  %v865_v17 = vsel (!%p1256_p7), %vm864_vm2, %v2163_v52, -inf }
 0x2c8   : > { %866 = vmax.xlane.f32.xlu0 %v865_v17 }
 0x355   : > { %v867_v1 = vpop.xlane.xlu0 %866 }
 0x356   : > { %v868_v41 = vmax.f32 %v863_v27, %v867_v1 }
 0x358   : > { %v869_v31 = vsub.f32 %v863_v27, %v868_v41  ;;  %967 = vst.msk [vmem:[#allocation2] sm:$0xf] %vm886_vm3, %v868_v41  ;;  %874 = vperm.xlu0 %1625, %v868_v41  }
 0x35a   : > { %v870_v38 = vmul.f32 1.442695, %v869_v31 }
 0x3d7   : > { %v875_v50 = vpop.permute.xlu0 %874 }
 0x3d8   : > { %v877_v13 = vsub.f32 %v2163_v52, %v875_v50 }
 0x3da   : > { %v878_v21 = vmul.f32 1.442695, %v877_v13 }
 0x3dc   : > { %1627 = vpow2.f32 %v878_v21 }
 0x3dd   : > { %1629 = vpow2.f32 %v870_v38 }
 0x3e6   : > { %v1628_v39 = vpop.eup %1627 }
 0x3e7   : > { %1383 = vmatmul.mubr.f32.vlgmr.msra.gmra.mrb[0].mxu0 %v1628_v39  ;;  %v882_v34 = vsel %vm864_vm2, %v1628_v39, 0.0  ;;  %v1630_v43 = vpop.eup %1629 }
 0x3e8   : > { %883 = vadd.xlane.f32.xlu1 %v882_v34  ;;  %v881_v15 = vmul.f32 %v1630_v43, %v880_v29 }
 0x3f9   : > { %891 = vperm.xlu1 %1626, %v1630_v43  }
 0x475   : > { %v884_v63 = vpop.xlane.xlu1 %883 }
 0x476   : > { %v885_v0 = vadd.f32 %v884_v63, %v881_v15 }
 0x478   : > { %887 = vst.msk [vmem:[#allocation3] sm:$0xf] %vm886_vm3, %v885_v0 }
 0x479   : > { %v892_v56 = vpop.permute.xlu1 %891 }
 0x47a   : > { %v894_v42 = vmul.f32 %v892_v56, %v888_v4 }
 0x4ba   : > { %v961_v46 = vpop.f32.mrb[0].mxu0 }
 0x4bb   : > { %v965_v33 = vadd.f32 %v961_v46, %v894_v42  ;;  %v1384_v61 = vpop.f32.mrb[1].mxu0 }
 0x4bd   : > { %966 = vst [vmem:[#allocation4] sm:$0xf] %v965_v33 }
 0x4be PF: > { %p1257_p8 = scmp.le.s32.totalorder %s2161_s15, 200 }
 0x4bf   : > { %v973_v10 = vand.u32 (!%p1257_p8), 127, %v404_v3  ;;  %v974_v14 = vstv (!%p1257_p8), %s1255_s13  ;;  %vm979_vm5 = vcmask (!%p1257_p8), 1043456   ;;  %v1670_v44 = vmov (!%p1257_p8), 0  }
 0x4c0   : > { %971 = sbr.rel (%p1257_p8) target bundleno = 1724 (0x6bc), region = 48  ;;  %1631 = vset.pattern.permute.xlu0 (!%p1257_p8), %v1670_v44  ;;  %1632 = vset.pattern.permute.xlu1 (!%p1257_p8), %v1670_v44  ;;  %v1501_v51 = vpack.c.bf16 (!%p1257_p8), %v2111_v9, %v2108_v26  ;;  %v1671_v53 = vmov (!%p1257_p8), 0.0|0.0   ;;  %v1504_v3 = vpack.c.bf16 (!%p1257_p8), %v2117_v58, %v2114_v12  ;;  %v1507_v19 = vpack.c.bf16 (!%p1257_p8), %v2126_v8, %v2123_v47  ;;  %v978_v26 = vld [vmem:[#allocation2] sm:$0xf] (!%p1257_p8) }
 0x4c1   : > { %v975_v16 = vadd.s32 (!%p1257_p8), %v974_v14, %v973_v10  ;;  %1500 = vmatprep.subr.bf16.mxu0 (!%p1257_p8), %v1671_v53  ;;  %v1510_v18 = vpack.c.bf16 (!%p1257_p8), %v2132_v20, %v2129_v7  ;;  %vm1001_vm7 = vcmask (!%p1257_p8), 3072   ;;  %v1513_v12 = vpack.c.bf16 (!%p1257_p8), %v2138_v55, %v2135_v25 }
 0x4c2   : > { %1502 = vmatpush3.bf16.msra.mxu0 (!%p1257_p8), %v1501_v51  ;;  %v1516_v47 = vpack.c.bf16 (!%p1257_p8), %v2144_v54, %v2141_v28  ;;  %v1519_v8 = vpack.c.bf16 (!%p1257_p8), %v2150_v24, %v2147_v62  ;;  %vm1672_vm8 = vmmov (!%p1257_p8), 0   ;;  %v1673_v7 = vmov (!%p1257_p8), 0.0   ;;  %v995_v24 = vld [vmem:[#allocation3] sm:$0xf] (!%p1257_p8) }
 0x4c3   : > { %vm976_vm6 = vcmp.lt.s32.totalorder (!%p1257_p8), %v975_v16, 200  ;;  %1503 = vmatprep.subr.bf16.mxu0 (!%p1257_p8), %v1671_v53  ;;  %1417 = vmatprep.mubr.msk.f32.mxu0 (!%p1257_p8), %vm1672_vm8, %v1673_v7  ;;  %v1522_v20 = vpack.c.bf16 (!%p1257_p8), %v2156_v59, %v2153_v57 }
 0x4c4   : > { %v977_v40 = vsel (!%p1257_p8), %vm976_vm6, %v2163_v52, -1e+30  ;;  %v1003_v57 = vld [vmem:[#allocation4] sm:$0xf] (!%p1257_p8) }
 0x4c5   : > { %v980_v6 = vsel (!%p1257_p8), %vm979_vm5, %v977_v40, -inf }
 0x4c6   : > { %981 = vmax.xlane.f32.xlu0 (!%p1257_p8), %v980_v6  ;;  %1505 = vmatpush3.bf16.msra.mxu0 (!%p1257_p8), %v1504_v3 }
 0x4c7   : > { %1506 = vmatprep.subr.bf16.mxu0 %v1671_v53 }
 0x4ca   : > { %1508 = vmatpush3.bf16.msra.mxu0 %v1507_v19 }
 0x4cb   : > { %1509 = vmatprep.subr.bf16.mxu0 %v1671_v53 }
 0x4ce   : > { %1511 = vmatpush3.bf16.msra.mxu0 %v1510_v18 }
 0x4cf   : > { %1512 = vmatprep.subr.bf16.mxu0 %v1671_v53 }
 0x4d2   : > { %1514 = vmatpush3.bf16.msra.mxu0 %v1513_v12 }
 0x4d3   : > { %1515 = vmatprep.subr.bf16.mxu0 %v1671_v53 }
 0x4d6   : > { %1517 = vmatpush3.bf16.msra.mxu0 %v1516_v47 }
 0x4d7   : > { %1518 = vmatprep.subr.bf16.mxu0 %v1671_v53 }
 0x4da   : > { %1520 = vmatpush3.bf16.msra.mxu0 %v1519_v8 }
 0x4db   : > { %1521 = vmatprep.subr.bf16.mxu0 %v1671_v53 }
 0x4de   : > { %1523 = vmatpush3.bf16.msra.mxu0 %v1522_v20 }
 0x553   : > { %v982_v9 = vpop.xlane.xlu0 %981 }
 0x554   : > { %v983_v22 = vmax.f32 %v978_v26, %v982_v9 }
 0x556   : > { %v984_v58 = vsub.f32 %v978_v26, %v983_v22  ;;  %1082 = vst.msk [vmem:[#allocation2] sm:$0xf] %vm1001_vm7, %v983_v22  ;;  %989 = vperm.xlu0 %1631, %v983_v22  }
 0x558   : > { %v985_v54 = vmul.f32 1.442695, %v984_v58 }
 0x5d5   : > { %v990_v25 = vpop.permute.xlu0 %989 }
 0x5d6   : > { %v992_v55 = vsub.f32 %v977_v40, %v990_v25 }
 0x5d8   : > { %v993_v32 = vmul.f32 1.442695, %v992_v55 }
 0x5da   : > { %1633 = vpow2.f32 %v993_v32 }
 0x5db   : > { %1635 = vpow2.f32 %v985_v54 }
 0x5e4   : > { %v1634_v52 = vpop.eup %1633 }
 0x5e5   : > { %1418 = vmatmul.mubr.f32.vlgmr.msra.gmra.mrb[0].mxu0 %v1634_v52  ;;  %v997_v28 = vsel %vm979_vm5, %v1634_v52, 0.0  ;;  %v1636_v62 = vpop.eup %1635 }
 0x5e6   : > { %998 = vadd.xlane.f32.xlu1 %v997_v28  ;;  %v996_v5 = vmul.f32 %v1636_v62, %v995_v24 }
 0x5f7   : > { %1006 = vperm.xlu1 %1632, %v1636_v62  }
 0x673   : > { %v999_v17 = vpop.xlane.xlu1 %998 }
 0x674   : > { %v1000_v11 = vadd.f32 %v999_v17, %v996_v5 }
 0x676   : > { %1002 = vst.msk [vmem:[#allocation3] sm:$0xf] %vm1001_vm7, %v1000_v11 }
 0x677   : > { %v1007_v59 = vpop.permute.xlu1 %1006 }
 0x678   : > { %v1009_v2 = vmul.f32 %v1007_v59, %v1003_v57 }
 0x6b8   : > { %v1076_v23 = vpop.f32.mrb[0].mxu0 }
 0x6b9   : > { %v1080_v36 = vadd.f32 %v1076_v23, %v1009_v2  ;;  %v1419_v37 = vpop.f32.mrb[1].mxu0 }
 0x6bb   : > { %1081 = vst [vmem:[#allocation4] sm:$0xf] %v1080_v36 }
 0x6bc PF: > { %p1258_p9 = scmp.ne.s32.totalorder %s1651_s24, 1 }
 0x6bd   : > { %v1087_v60 = vld [vmem:[#allocation2] sm:$0xf] (!%p1258_p9)  ;;  %vm1088_vm9 = vcmask (!%p1258_p9), 3072   ;;  %v1090_v27 = vld [vmem:[#allocation3] sm:$0xf] (!%p1258_p9) }
 0x6be   : > { %1086 = sbr.rel (%p1258_p9) target bundleno = 1733 (0x6c5), region = 52  ;;  %1089 = vst.msk [vmem:[%s2239_s5] sm:$0xf] (!%p1258_p9), %vm1088_vm9, %v1087_v60  ;;  %1091 = vst.msk [vmem:[%s2240_s6] sm:$0xf] (!%p1258_p9), %vm1088_vm9, %v1090_v27 }
 0x6c2   : > { %v1092_v1 = vld [vmem:[#allocation4] sm:$0xf] (!%p1258_p9) }
 0x6c3   : > { %1093 = vst [vmem:[%s2241_s7] sm:$0xf] (!%p1258_p9), %v1092_v1 }
 0x6c5 PF: > { %s18_s26 = sadd.s32 1, %s1659_s26   ;;  %s2242_s24 = smov %s1655_s25 }
 0x6c6   : > { %p15_p10 = scmp.ge.s32.totalorder %s18_s26, 4   ;;  %s2243_s25 = smov %s2245_s27 }
 0x6c8   :  { %17 = sbr.rel (!%p15_p10) target bundleno = 2 (0x2), region = 118 }

</bundles_post_ra>
